<compile_context>
chip_gen: v7x
topology: tpu7x:2x2x1
jax: 0.10.0
libtpu: 0.0.40
codegen_flags: <defaults>
</compile_context>

<pallas_src>
import functools

import jax
import jax.numpy as jnp
import numpy as np
from jax import lax
from jax.experimental import pallas as pl
from jax.experimental.pallas import tpu as pltpu


def fused_basic_block_kernel(x_ref, mask_ref, w1_ref, w2_ref,
                             bn1s_ref, bn1b_ref, bn2s_ref, bn2b_ref, srow_ref,
                             o_ref, *, Wp, off0, Wout, C, B):
  # x_ref    : (C, Wout)       f32  both images' padded flats back-to-back
  # mask_ref : (1, Wout)       f32  1.0 at real interior pixels, else 0.0
  # w1_ref   : (B*C, 9*C)      bf16 stage-1 weights, all bases stacked on rows
  # w2_ref   : (B*C, 9*B*C)    bf16 stage-2 block-diagonal weights (tap-major,
  #                                 then base, then cin on columns)
  # bn*_ref  : (B*C, 1)        f32  folded BN constants (bn2 also has the
  #                                 per-base output scale folded in)
  # srow_ref : (B*C, 1)        f32  per-base output scale, repeated per channel
  # o_ref    : (C, Wout)       f32  sum over bases (interior sliced outside)
  shifts = [off0 + (dy - 1) * Wp + (dx - 1) for dy in range(3) for dx in range(3)]

  def im2col(v):
    # v: (rows, Wout), zero at conv-padding / non-image columns.
    # Add 128-lane zero margins (aligned concat) so every tap is a static
    # lane-shifted slab; stack the 9 slabs -> one MXU matmul RHS.
    rows = v.shape[0]
    buf = jnp.concatenate(
        [jnp.zeros((rows, off0), v.dtype), v, jnp.zeros((rows, off0), v.dtype)],
        axis=1)                                                  # (rows, Wout+2*off0)
    return jnp.concatenate([buf[:, s:s + Wout] for s in shifts], axis=0)

  x = x_ref[...]                                                 # (C, Wout) f32
  xq = jnp.tanh(x).astype(jnp.bfloat16)                          # tanh(0)=0 keeps padding zero
  res_all = jnp.concatenate([x] * B, axis=0)                     # (B*C, Wout) pre-tanh residual

  # ---- stage 1: all bases in one MXU call -------------------------------
  z1 = jnp.dot(w1_ref[...], im2col(xq),
               preferred_element_type=jnp.float32)               # (B*C, Wout)
  out_all = jnp.maximum(z1, 0.0) * bn1s_ref[...] + bn1b_ref[...] + res_all

  # ---- stage 2: block-diagonal weights, one MXU call --------------------
  t2 = (jnp.tanh(out_all) * mask_ref[...]).astype(jnp.bfloat16)  # zero at padding
  z2 = jnp.dot(w2_ref[...], im2col(t2),
               preferred_element_type=jnp.float32)               # (B*C, Wout)

  # scale * out_new = relu(z2)*(scale*bn2s) + scale*bn2b + scale*out
  tmp = jnp.maximum(z2, 0.0) * bn2s_ref[...] + bn2b_ref[...] + srow_ref[...] * out_all

  acc = tmp[:C]
  for b in range(1, B):
    acc = acc + tmp[b * C:(b + 1) * C]
  o_ref[...] = acc.astype(o_ref.dtype)


def basic_block_forward(x_nchw, bases):
  """Pallas implementation of BasicBlock.forward (downsample=None, stride=1)."""
  N, C, H, W = x_nchw.shape
  Hp, Wp = H + 2, W + 2
  Q = Hp * Wp                               # padded flat size per image
  Qtot = N * Q                              # images back-to-back on lanes
  WIN = ((Qtot + 127) // 128) * 128         # 128-aligned compute window
  MARGIN = 128                              # aligned slab margin (>= Wp+1)
  B = len(bases)

  # Channel-major flat layout: (C, WIN), image i's padded flat at [i*Q, i*Q+Q).
  xpad = jnp.pad(x_nchw, ((0, 0), (0, 0), (1, 1), (1, 1))).reshape(N, C, Q)
  xflat = jnp.transpose(xpad, (1, 0, 2)).reshape(C, Qtot)
  xflat = jnp.pad(xflat, ((0, 0), (0, WIN - Qtot)))

  # Interior mask over window columns (compile-time constant).
  q = np.arange(WIN)
  r = q % Q
  iy, ix = r // Wp, r % Wp
  interior = ((q < Qtot) & (iy >= 1) & (iy <= H) & (ix >= 1) & (ix <= W))
  mask = jnp.asarray(interior.astype(np.float32)).reshape(1, WIN)

  def pack_taps(w):
    # HWIO (3,3,Cin,Cout) -> (Cout, 9, Cin), tap-major to match slab order.
    return jnp.transpose(w, (3, 0, 1, 2)).reshape(C, 9, C)

  # Stage-1 weights: all bases stacked along rows -> (B*C, 9*C), bf16.
  w1 = jnp.concatenate([pack_taps(b["w1"]).reshape(C, 9 * C) for b in bases],
                       axis=0).astype(jnp.bfloat16)

  # Stage-2 weights: block-diagonal across bases, columns ordered
  # (tap, base, cin) to match the merged (B*C)-row slabs -> (B*C, 9*B*C), bf16.
  w2_full = jnp.zeros((B, C, 9, B, C), jnp.float32)
  for b, base in enumerate(bases):
    w2_full = w2_full.at[b, :, :, b, :].set(pack_taps(base["w2"]))
  w2 = w2_full.reshape(B * C, 9 * B * C).astype(jnp.bfloat16)

  bn1s = jnp.concatenate([b["bn1_scale"] for b in bases]).reshape(B * C, 1)
  bn1b = jnp.concatenate([b["bn1_shift"] for b in bases]).reshape(B * C, 1)
  # Fold the per-base output scale into the bn2 constants.
  bn2s = jnp.concatenate([b["scale"] * b["bn2_scale"] for b in bases]).reshape(B * C, 1)
  bn2b = jnp.concatenate([b["scale"] * b["bn2_shift"] for b in bases]).reshape(B * C, 1)
  srow = jnp.concatenate([jnp.broadcast_to(b["scale"], (C,)) for b in bases]).reshape(B * C, 1)

  kernel = functools.partial(fused_basic_block_kernel,
                             Wp=Wp, off0=MARGIN, Wout=WIN, C=C, B=B)
  rep2 = lambda i: (0, 0)

  out_flat = pl.pallas_call(
      kernel,
      out_shape=jax.ShapeDtypeStruct((C, WIN), x_nchw.dtype),
      grid_spec=pltpu.PrefetchScalarGridSpec(
          num_scalar_prefetch=0,
          grid=(1,),
          in_specs=[
              pl.BlockSpec((C, WIN), rep2),            # x (flat, both images)
              pl.BlockSpec((1, WIN), rep2),            # interior mask
              pl.BlockSpec((B * C, 9 * C), rep2),      # w1 (merged bases)
              pl.BlockSpec((B * C, 9 * B * C), rep2),  # w2 (block-diagonal)
              pl.BlockSpec((B * C, 1), rep2),          # bn1 scale
              pl.BlockSpec((B * C, 1), rep2),          # bn1 shift
              pl.BlockSpec((B * C, 1), rep2),          # scale*bn2 scale
              pl.BlockSpec((B * C, 1), rep2),          # scale*bn2 shift
              pl.BlockSpec((B * C, 1), rep2),          # per-base output scale
          ],
          out_specs=pl.BlockSpec((C, WIN), rep2),
      ),
      compiler_params=pltpu.CompilerParams(
          dimension_semantics=("arbitrary",)),
  )(xflat, mask, w1, w2, bn1s, bn1b, bn2s, bn2b, srow)

  # Extract the interiors and return NCHW.
  out = out_flat[:, :Qtot].reshape(C, N, Hp, Wp)
  return jnp.transpose(out, (1, 0, 2, 3))[:, :, 1:H + 1, 1:W + 1]


def reference_forward(x_nchw, bases):
  """Pure-JAX reference (same math, lax conv at HIGHEST precision)."""
  x = jnp.transpose(x_nchw, (0, 2, 3, 1))
  residual = x
  xq = jnp.tanh(x)
  dn = ('NHWC', 'HWIO', 'NHWC')
  final = None
  for b in bases:
    out = lax.conv_general_dilated(xq, b["w1"], (1, 1), ((1, 1), (1, 1)),
                                   dimension_numbers=dn,
                                   precision=lax.Precision.HIGHEST)
    out = jnp.maximum(out, 0.0)
    out = out * b["bn1_scale"] + b["bn1_shift"]
    out = out + residual
    out_q = jnp.tanh(out)
    out_new = lax.conv_general_dilated(out_q, b["w2"], (1, 1), ((1, 1), (1, 1)),
                                       dimension_numbers=dn,
                                       precision=lax.Precision.HIGHEST)
    out_new = jnp.maximum(out_new, 0.0)
    out_new = out_new * b["bn2_scale"] + b["bn2_shift"]
    out_new = out_new + out
    term = b["scale"] * out_new
    final = term if final is None else final + term
  return jnp.transpose(final, (0, 3, 1, 2))


def init_params(key, num_bases, inplanes, planes, eps=1e-5):
  bases = []
  for _ in range(num_bases):
    key, *ks = jax.random.split(key, 12)
    w1 = 0.1 * jax.random.normal(ks[0], (3, 3, inplanes, planes), jnp.float32)
    w2 = 0.1 * jax.random.normal(ks[1], (3, 3, planes, planes), jnp.float32)
    g1 = 1.0 + 0.1 * jax.random.normal(ks[2], (planes,), jnp.float32)
    b1 = 0.1 * jax.random.normal(ks[3], (planes,), jnp.float32)
    m1 = 0.05 * jax.random.normal(ks[4], (planes,), jnp.float32)
    v1 = jax.random.uniform(ks[5], (planes,), jnp.float32, 0.5, 1.5)
    g2 = 1.0 + 0.1 * jax.random.normal(ks[6], (planes,), jnp.float32)
    b2 = 0.1 * jax.random.normal(ks[7], (planes,), jnp.float32)
    m2 = 0.05 * jax.random.normal(ks[8], (planes,), jnp.float32)
    v2 = jax.random.uniform(ks[9], (planes,), jnp.float32, 0.5, 1.5)
    scale = jax.random.uniform(ks[10], (), jnp.float32)  # torch.rand(1)
    bn1_scale = g1 / jnp.sqrt(v1 + eps)
    bn1_shift = b1 - m1 * bn1_scale
    bn2_scale = g2 / jnp.sqrt(v2 + eps)
    bn2_shift = b2 - m2 * bn2_scale
    bases.append(dict(w1=w1, w2=w2,
                      bn1_scale=bn1_scale, bn1_shift=bn1_shift,
                      bn2_scale=bn2_scale, bn2_shift=bn2_shift,
                      scale=scale))
  return bases


if __name__ == "__main__":
  # batch=2, inplanes=planes=8, spatial=16x16, num_bases=2, bitW=bitA=32,
  # stride=1, downsample=None.
  N, C, H, W = 2, 8, 16, 16
  num_bases = 2

  key = jax.random.PRNGKey(0)
  key, kx = jax.random.split(key)
  x = jax.random.normal(kx, (N, C, H, W), jnp.float32)   # NCHW, like PyTorch
  bases = init_params(key, num_bases, inplanes=C, planes=C)

  fwd = jax.jit(basic_block_forward)
  ref_fwd = jax.jit(reference_forward)

  out = jax.block_until_ready(fwd(x, bases))
  ref = jax.block_until_ready(ref_fwd(x, bases))

  assert out.shape == (N, C, H, W), out.shape
  assert jnp.allclose(out, ref, rtol=2e-2, atol=2e-2), float(
      jnp.max(jnp.abs(out - ref)))

  print("KERNEL_OK")
</pallas_src>

<mosaic_0001>
module attributes {stable_mosaic.version = 11 : i64} {
  func.func @fused_basic_block_kernel(%arg0: i32, %arg1: memref<8x768xf32, #tpu.memory_space<vmem>>, %arg2: memref<1x768xf32, #tpu.memory_space<vmem>>, %arg3: memref<16x72xbf16, #tpu.memory_space<vmem>>, %arg4: memref<16x144xbf16, #tpu.memory_space<vmem>>, %arg5: memref<16x1xf32, #tpu.memory_space<vmem>>, %arg6: memref<16x1xf32, #tpu.memory_space<vmem>>, %arg7: memref<16x1xf32, #tpu.memory_space<vmem>>, %arg8: memref<16x1xf32, #tpu.memory_space<vmem>>, %arg9: memref<16x1xf32, #tpu.memory_space<vmem>>, %arg10: memref<8x768xf32, #tpu.memory_space<vmem>>) attributes {dimension_semantics = [#tpu.dimension_semantics<arbitrary>], iteration_bounds = array<i64: 1>, scalar_prefetch = 0 : i64, scratch_operands = 0 : i64, tpu.core_type = #tpu.core_type<tc>, window_params = [{pipeline_mode = #tpu.pipeline_mode<synchronous>, transform_indices = @transform_0, window_bounds = array<i64: 8, 768>}, {pipeline_mode = #tpu.pipeline_mode<synchronous>, transform_indices = @transform_1, window_bounds = array<i64: 1, 768>}, {pipeline_mode = #tpu.pipeline_mode<synchronous>, transform_indices = @transform_2, window_bounds = array<i64: 16, 72>}, {pipeline_mode = #tpu.pipeline_mode<synchronous>, transform_indices = @transform_3, window_bounds = array<i64: 16, 144>}, {pipeline_mode = #tpu.pipeline_mode<synchronous>, transform_indices = @transform_4, window_bounds = array<i64: 16, 1>}, {pipeline_mode = #tpu.pipeline_mode<synchronous>, transform_indices = @transform_5, window_bounds = array<i64: 16, 1>}, {pipeline_mode = #tpu.pipeline_mode<synchronous>, transform_indices = @transform_6, window_bounds = array<i64: 16, 1>}, {pipeline_mode = #tpu.pipeline_mode<synchronous>, transform_indices = @transform_7, window_bounds = array<i64: 16, 1>}, {pipeline_mode = #tpu.pipeline_mode<synchronous>, transform_indices = @transform_8, window_bounds = array<i64: 16, 1>}, {pipeline_mode = #tpu.pipeline_mode<synchronous>, transform_indices = @transform_9, window_bounds = array<i64: 8, 768>}]} {
    %c0 = arith.constant 0 : index
    %c0_0 = arith.constant 0 : index
    %0 = vector.load %arg1[%c0, %c0_0] : memref<8x768xf32, #tpu.memory_space<vmem>>, vector<8x768xf32>
    %1 = math.tanh %0 : vector<8x768xf32>
    %2 = arith.truncf %1 : vector<8x768xf32> to vector<8x768xbf16>
    %3 = tpu.concatenate %0, %0 in 0 : vector<8x768xf32>, vector<8x768xf32> -> vector<16x768xf32>
    %c0_1 = arith.constant 0 : index
    %c0_2 = arith.constant 0 : index
    %4 = vector.load %arg3[%c0_1, %c0_2] : memref<16x72xbf16, #tpu.memory_space<vmem>>, vector<16x72xbf16>
    %cst = arith.constant 0.000000e+00 : bf16
    %5 = vector.broadcast %cst : bf16 to vector<8x128xbf16>
    %cst_3 = arith.constant 0.000000e+00 : bf16
    %6 = vector.broadcast %cst_3 : bf16 to vector<8x128xbf16>
    %7 = tpu.concatenate %5, %2, %6 in 1 : vector<8x128xbf16>, vector<8x768xbf16>, vector<8x128xbf16> -> vector<8x1024xbf16>
    %8 = vector.extract_strided_slice %7 {offsets = [0, 109], sizes = [8, 768], strides = [1, 1]} : vector<8x1024xbf16> to vector<8x768xbf16>
    %9 = vector.extract_strided_slice %7 {offsets = [0, 110], sizes = [8, 768], strides = [1, 1]} : vector<8x1024xbf16> to vector<8x768xbf16>
    %10 = vector.extract_strided_slice %7 {offsets = [0, 111], sizes = [8, 768], strides = [1, 1]} : vector<8x1024xbf16> to vector<8x768xbf16>
    %11 = vector.extract_strided_slice %7 {offsets = [0, 127], sizes = [8, 768], strides = [1, 1]} : vector<8x1024xbf16> to vector<8x768xbf16>
    %12 = vector.extract_strided_slice %7 {offsets = [0, 128], sizes = [8, 768], strides = [1, 1]} : vector<8x1024xbf16> to vector<8x768xbf16>
    %13 = vector.extract_strided_slice %7 {offsets = [0, 129], sizes = [8, 768], strides = [1, 1]} : vector<8x1024xbf16> to vector<8x768xbf16>
    %14 = vector.extract_strided_slice %7 {offsets = [0, 145], sizes = [8, 768], strides = [1, 1]} : vector<8x1024xbf16> to vector<8x768xbf16>
    %15 = vector.extract_strided_slice %7 {offsets = [0, 146], sizes = [8, 768], strides = [1, 1]} : vector<8x1024xbf16> to vector<8x768xbf16>
    %16 = vector.extract_strided_slice %7 {offsets = [0, 147], sizes = [8, 768], strides = [1, 1]} : vector<8x1024xbf16> to vector<8x768xbf16>
    %17 = tpu.concatenate %8, %9, %10, %11, %12, %13, %14, %15, %16 in 0 : vector<8x768xbf16>, vector<8x768xbf16>, vector<8x768xbf16>, vector<8x768xbf16>, vector<8x768xbf16>, vector<8x768xbf16>, vector<8x768xbf16>, vector<8x768xbf16>, vector<8x768xbf16> -> vector<72x768xbf16>
    %cst_4 = arith.constant dense<0.000000e+00> : vector<16x768xf32>
    %18 = tpu.matmul %4, %17, %cst_4 {dimension_numbers = #tpu.dot_dimension_numbers<[1], [0], [0], [1], [0, 0, 1, 1], [], []>} : vector<16x72xbf16>, vector<72x768xbf16>, vector<16x768xf32> -> vector<16x768xf32>
    %cst_5 = arith.constant 0.000000e+00 : f32
    %19 = vector.broadcast %cst_5 : f32 to vector<16x768xf32>
    %20 = arith.maximumf %18, %19 : vector<16x768xf32>
    %c0_6 = arith.constant 0 : index
    %c0_7 = arith.constant 0 : index
    %21 = vector.load %arg5[%c0_6, %c0_7] : memref<16x1xf32, #tpu.memory_space<vmem>>, vector<16x1xf32>
    %22 = vector.broadcast %21 : vector<16x1xf32> to vector<16x768xf32>
    %23 = arith.mulf %20, %22 : vector<16x768xf32>
    %c0_8 = arith.constant 0 : index
    %c0_9 = arith.constant 0 : index
    %24 = vector.load %arg6[%c0_8, %c0_9] : memref<16x1xf32, #tpu.memory_space<vmem>>, vector<16x1xf32>
    %25 = vector.broadcast %24 : vector<16x1xf32> to vector<16x768xf32>
    %26 = arith.addf %23, %25 : vector<16x768xf32>
    %27 = arith.addf %26, %3 : vector<16x768xf32>
    %28 = math.tanh %27 : vector<16x768xf32>
    %c0_10 = arith.constant 0 : index
    %c0_11 = arith.constant 0 : index
    %29 = vector.load %arg2[%c0_10, %c0_11] : memref<1x768xf32, #tpu.memory_space<vmem>>, vector<1x768xf32>
    %30 = vector.broadcast %29 : vector<1x768xf32> to vector<16x768xf32>
    %31 = arith.mulf %28, %30 : vector<16x768xf32>
    %32 = arith.truncf %31 : vector<16x768xf32> to vector<16x768xbf16>
    %c0_12 = arith.constant 0 : index
    %c0_13 = arith.constant 0 : index
    %33 = vector.load %arg4[%c0_12, %c0_13] : memref<16x144xbf16, #tpu.memory_space<vmem>>, vector<16x144xbf16>
    %cst_14 = arith.constant 0.000000e+00 : bf16
    %34 = vector.broadcast %cst_14 : bf16 to vector<16x128xbf16>
    %cst_15 = arith.constant 0.000000e+00 : bf16
    %35 = vector.broadcast %cst_15 : bf16 to vector<16x128xbf16>
    %36 = tpu.concatenate %34, %32, %35 in 1 : vector<16x128xbf16>, vector<16x768xbf16>, vector<16x128xbf16> -> vector<16x1024xbf16>
    %37 = vector.extract_strided_slice %36 {offsets = [0, 109], sizes = [16, 768], strides = [1, 1]} : vector<16x1024xbf16> to vector<16x768xbf16>
    %38 = vector.extract_strided_slice %36 {offsets = [0, 110], sizes = [16, 768], strides = [1, 1]} : vector<16x1024xbf16> to vector<16x768xbf16>
    %39 = vector.extract_strided_slice %36 {offsets = [0, 111], sizes = [16, 768], strides = [1, 1]} : vector<16x1024xbf16> to vector<16x768xbf16>
    %40 = vector.extract_strided_slice %36 {offsets = [0, 127], sizes = [16, 768], strides = [1, 1]} : vector<16x1024xbf16> to vector<16x768xbf16>
    %41 = vector.extract_strided_slice %36 {offsets = [0, 128], sizes = [16, 768], strides = [1, 1]} : vector<16x1024xbf16> to vector<16x768xbf16>
    %42 = vector.extract_strided_slice %36 {offsets = [0, 129], sizes = [16, 768], strides = [1, 1]} : vector<16x1024xbf16> to vector<16x768xbf16>
    %43 = vector.extract_strided_slice %36 {offsets = [0, 145], sizes = [16, 768], strides = [1, 1]} : vector<16x1024xbf16> to vector<16x768xbf16>
    %44 = vector.extract_strided_slice %36 {offsets = [0, 146], sizes = [16, 768], strides = [1, 1]} : vector<16x1024xbf16> to vector<16x768xbf16>
    %45 = vector.extract_strided_slice %36 {offsets = [0, 147], sizes = [16, 768], strides = [1, 1]} : vector<16x1024xbf16> to vector<16x768xbf16>
    %46 = tpu.concatenate %37, %38, %39, %40, %41, %42, %43, %44, %45 in 0 : vector<16x768xbf16>, vector<16x768xbf16>, vector<16x768xbf16>, vector<16x768xbf16>, vector<16x768xbf16>, vector<16x768xbf16>, vector<16x768xbf16>, vector<16x768xbf16>, vector<16x768xbf16> -> vector<144x768xbf16>
    %cst_16 = arith.constant dense<0.000000e+00> : vector<16x768xf32>
    %47 = tpu.matmul %33, %46, %cst_16 {dimension_numbers = #tpu.dot_dimension_numbers<[1], [0], [0], [1], [0, 0, 1, 1], [], []>} : vector<16x144xbf16>, vector<144x768xbf16>, vector<16x768xf32> -> vector<16x768xf32>
    %cst_17 = arith.constant 0.000000e+00 : f32
    %48 = vector.broadcast %cst_17 : f32 to vector<16x768xf32>
    %49 = arith.maximumf %47, %48 : vector<16x768xf32>
    %c0_18 = arith.constant 0 : index
    %c0_19 = arith.constant 0 : index
    %50 = vector.load %arg7[%c0_18, %c0_19] : memref<16x1xf32, #tpu.memory_space<vmem>>, vector<16x1xf32>
    %51 = vector.broadcast %50 : vector<16x1xf32> to vector<16x768xf32>
    %52 = arith.mulf %49, %51 : vector<16x768xf32>
    %c0_20 = arith.constant 0 : index
    %c0_21 = arith.constant 0 : index
    %53 = vector.load %arg8[%c0_20, %c0_21] : memref<16x1xf32, #tpu.memory_space<vmem>>, vector<16x1xf32>
    %54 = vector.broadcast %53 : vector<16x1xf32> to vector<16x768xf32>
    %55 = arith.addf %52, %54 : vector<16x768xf32>
    %c0_22 = arith.constant 0 : index
    %c0_23 = arith.constant 0 : index
    %56 = vector.load %arg9[%c0_22, %c0_23] : memref<16x1xf32, #tpu.memory_space<vmem>>, vector<16x1xf32>
    %57 = vector.broadcast %56 : vector<16x1xf32> to vector<16x768xf32>
    %58 = arith.mulf %57, %27 : vector<16x768xf32>
    %59 = arith.addf %55, %58 : vector<16x768xf32>
    %60 = vector.extract_strided_slice %59 {offsets = [0, 0], sizes = [8, 768], strides = [1, 1]} : vector<16x768xf32> to vector<8x768xf32>
    %61 = vector.extract_strided_slice %59 {offsets = [8, 0], sizes = [8, 768], strides = [1, 1]} : vector<16x768xf32> to vector<8x768xf32>
    %62 = arith.addf %60, %61 : vector<8x768xf32>
    %c0_24 = arith.constant 0 : index
    %c0_25 = arith.constant 0 : index
    %63 = vector.load %arg10[%c0_24, %c0_25] : memref<8x768xf32, #tpu.memory_space<vmem>>, vector<8x768xf32>
    tpu.vector_store %arg10[%c0_24, %c0_25], %62 {strides = array<i32>} : memref<8x768xf32, #tpu.memory_space<vmem>>, vector<8x768xf32>,
    return
  }
  func.func @transform_0(%arg0: i32) -> (i32, i32) {
    %c0_i32 = arith.constant 0 : i32
    %c0_i32_0 = arith.constant 0 : i32
    %c0_i32_1 = arith.constant 0 : i32
    return %c0_i32, %c0_i32_0 : i32, i32
  }
  func.func @transform_1(%arg0: i32) -> (i32, i32) {
    %c0_i32 = arith.constant 0 : i32
    %c0_i32_0 = arith.constant 0 : i32
    %c0_i32_1 = arith.constant 0 : i32
    return %c0_i32, %c0_i32_0 : i32, i32
  }
  func.func @transform_2(%arg0: i32) -> (i32, i32) {
    %c0_i32 = arith.constant 0 : i32
    %c0_i32_0 = arith.constant 0 : i32
    %c0_i32_1 = arith.constant 0 : i32
    return %c0_i32, %c0_i32_0 : i32, i32
  }
  func.func @transform_3(%arg0: i32) -> (i32, i32) {
    %c0_i32 = arith.constant 0 : i32
    %c0_i32_0 = arith.constant 0 : i32
    %c0_i32_1 = arith.constant 0 : i32
    return %c0_i32, %c0_i32_0 : i32, i32
  }
  func.func @transform_4(%arg0: i32) -> (i32, i32) {
    %c0_i32 = arith.constant 0 : i32
    %c0_i32_0 = arith.constant 0 : i32
    %c0_i32_1 = arith.constant 0 : i32
    return %c0_i32, %c0_i32_0 : i32, i32
  }
  func.func @transform_5(%arg0: i32) -> (i32, i32) {
    %c0_i32 = arith.constant 0 : i32
    %c0_i32_0 = arith.constant 0 : i32
    %c0_i32_1 = arith.constant 0 : i32
    return %c0_i32, %c0_i32_0 : i32, i32
  }
  func.func @transform_6(%arg0: i32) -> (i32, i32) {
    %c0_i32 = arith.constant 0 : i32
    %c0_i32_0 = arith.constant 0 : i32
    %c0_i32_1 = arith.constant 0 : i32
    return %c0_i32, %c0_i32_0 : i32, i32
  }
  func.func @transform_7(%arg0: i32) -> (i32, i32) {
    %c0_i32 = arith.constant 0 : i32
    %c0_i32_0 = arith.constant 0 : i32
    %c0_i32_1 = arith.constant 0 : i32
    return %c0_i32, %c0_i32_0 : i32, i32
  }
  func.func @transform_8(%arg0: i32) -> (i32, i32) {
    %c0_i32 = arith.constant 0 : i32
    %c0_i32_0 = arith.constant 0 : i32
    %c0_i32_1 = arith.constant 0 : i32
    return %c0_i32, %c0_i32_0 : i32, i32
  }
  func.func @transform_9(%arg0: i32) -> (i32, i32) {
    %c0_i32 = arith.constant 0 : i32
    %c0_i32_0 = arith.constant 0 : i32
    %c0_i32_1 = arith.constant 0 : i32
    return %c0_i32, %c0_i32_0 : i32, i32
  }
}

</mosaic_0001>

<bundles_post_ra>
// kernel: mul.8
= control target key start
LH: loop header
LB: loop body
LE: loop exit
PB: predicated region body
PF: predicated region fallthrough
CT: control target
= control target key end

     0   :  { %s20_s0 = inlined_call_operand.<no memory space> [shape: f32[], index: 0, kind: input, shape index: {}]   ;;  %s21_s1 = inlined_call_operand.vmem [shape: f32[8], index: 1, kind: output, shape index: {}]  }
   0x1   :  { %v2_v0 = vstv %s20_s0 }
   0x2   :  { %3 = vst [vmem:[%s21_s1] sm:$0x1] %v2_v0 }

// kernel: basic_block_forward.1
= control target key start
LH: loop header
LB: loop body
LE: loop exit
PB: predicated region body
PF: predicated region fallthrough
CT: control target
= control target key end

     0   :  { %v1471_v0 = vmov 0   ;;  %s1472_s17 = smov 127   ;;  %s1473_s20 = smov 126   ;;  %vm81_vm0 = vcmask 1039360   ;;  %vm232_vm1 = vcmask 1043456   ;;  %vm102_vm2 = vcmask 1031168   ;;  %s2465_s0 = inlined_call_operand.vmem [shape: f32[8,768], index: 0, kind: input, shape index: {}]   ;;  %s2466_s2 = inlined_call_operand.vmem [shape: bf16[16,72], index: 2, kind: input, shape index: {}]   ;;  %s2467_s4 = inlined_call_operand.vmem [shape: f32[16,1], index: 4, kind: input, shape index: {}]   ;;  %s2468_s5 = inlined_call_operand.vmem [shape: f32[16,1], index: 5, kind: input, shape index: {}]   ;;  %s2469_s1 = inlined_call_operand.vmem [shape: f32[1,768], index: 1, kind: input, shape index: {}]   ;;  %s2470_s3 = inlined_call_operand.vmem [shape: bf16[16,144], index: 3, kind: input, shape index: {}]   ;;  %s2471_s6 = inlined_call_operand.vmem [shape: f32[16,1], index: 6, kind: input, shape index: {}]   ;;  %s2472_s7 = inlined_call_operand.vmem [shape: f32[16,1], index: 7, kind: input, shape index: {}]   ;;  %s2473_s8 = inlined_call_operand.vmem [shape: f32[16,1], index: 8, kind: input, shape index: {}]   ;;  %s2474_s9 = inlined_call_operand.vmem [shape: f32[8,768], index: 9, kind: output, shape index: {}]  }
   0x1   :  { %v1532_v1 = vrot.slane %v1471_v0, 4  ;;  %v1537_v2 = vld [vmem:[%s2465_s0 + $0x8] sm:$0xff]  ;;  %v1542_v3 = vld [vmem:[%s2465_s0] sm:$0xff]  ;;  %v1547_v4 = vld [vmem:[%s2465_s0 + $0x10] sm:$0xff]  ;;  %529 = vmatprep.mubr.bf16.mxu0 %v1471_v0  ;;  %572 = vmatprep.mubr.bf16.mxu1 %v1471_v0  ;;  %s1474_s21 = smov 110   ;;  %s1475_s22 = smov 109  }
   0x2   :  { %1435 = vtanh.f32 %v1537_v2  ;;  %v1555_v5 = vld [vmem:[%s2465_s0 + $0x20] sm:$0xff]  ;;  %1430 = vset.pattern.permute.xlu1 %v1471_v0  ;;  %1429 = vset.pattern.permute.xlu0 %v1471_v0  ;;  %v1567_v6 = vld [vmem:[%s2465_s0 + $0x18] sm:$0xff]  ;;  %s1476_s23 = smov 108   ;;  %s1477_s24 = smov 92   ;;  %v1630_v22 = vld [vmem:[%s2465_s0 + $0x28] sm:$0xff]  ;;  %vm123_vm3 = vcmask 900096  }
   0x3   :  { %67 = vrot.lane.b32.xlu1 %v1532_v1, %s1472_s17  ;;  %1437 = vtanh.f32 %v1542_v3  ;;  %s1478_s25 = smov 91   ;;  %s1479_s0 = smov 90   ;;  %vm162_vm4 = vcmask 883712   ;;  %vm142_vm5 = vcmask 891904   ;;  %vm183_vm6 = vcmask 752640  }
   0x4   :  { %1439 = vtanh.f32 %v1547_v4  ;;  %s1480_s28 = smov 19   ;;  %vm204_vm7 = vcmask 744448   ;;  %vm225_vm8 = vcmask 736256   ;;  %vm420_vm9 = vcmask 154624  }
   0x5   :  { %1441 = vtanh.f32 %v1555_v5  ;;  %vm475_vm10 = vcmask 588800   ;;  %vm1162_vm11 = vcmask 130048  }
   0x6   :  { %1443 = vtanh.f32 %v1567_v6 }
   0x7   :  { %1445 = vtanh.f32 %v1630_v22 }
   0xc   :  { %v1436_v7 = vpop.eup %1435 }
   0xd   :  { %v1438_v8 = vpop.eup %1437  ;;  %v1570_v9 = vpack.c.bf16 %v1436_v7, %v1436_v7 }
   0xe   :  { %v1440_v10 = vpop.eup %1439  ;;  %v1572_v11 = vpack.c.bf16 %v1438_v8, %v1438_v8 }
   0xf   :  { %v1442_v12 = vpop.eup %1441  ;;  %92 = vrot.lane.b32.xlu1 %v1570_v9, %s1473_s20  ;;  %v1576_v13 = vpack.c.bf16 %v1440_v10, %v1440_v10  ;;  %v62_v19 = vrot.slane %v1570_v9, 4 }
  0x10   :  { %90 = vrot.lane.b32.xlu0 %v1572_v11, %s1473_s20  ;;  %v1580_v14 = vpack.c.bf16 %v1442_v12, %v1442_v12  ;;  %v61_v17 = vrot.slane %v1572_v11, 4  ;;  %v1444_v18 = vpop.eup %1443 }
  0x11   :  { %v63_v15 = vrot.slane %v1576_v13, 4  ;;  %v1591_v20 = vpack.c.bf16 %v1444_v18, %v1444_v18  ;;  %v1446_v23 = vpop.eup %1445 }
  0x12   :  { %v65_v16 = vrot.slane %v1580_v14, 4  ;;  %v1646_v24 = vpack.c.bf16 %v1446_v23, %v1446_v23 }
  0x13   :  { %73 = vrot.lane.b32.xlu1 %v63_v15, %s1472_s17  ;;  %v64_v21 = vrot.slane %v1591_v20, 4 }
  0x14   :  { %94 = vrot.lane.b32.xlu0 %v1576_v13, %s1473_s20  ;;  %v66_v25 = vrot.slane %v1646_v24, 4 }
  0x17   :  { %77 = vrot.lane.b32.xlu1 %v65_v16, %s1472_s17 }
  0x18   :  { %69 = vrot.lane.b32.xlu0 %v61_v17, %s1472_s17 }
  0x1b   :  { %111 = vrot.lane.b32.xlu1 %v61_v17, %s1474_s21 }
  0x1c   :  { %71 = vrot.lane.b32.xlu0 %v62_v19, %s1472_s17 }
  0x1f   :  { %115 = vrot.lane.b32.xlu1 %v63_v15, %s1474_s21 }
  0x20   :  { %75 = vrot.lane.b32.xlu0 %v64_v21, %s1472_s17 }
  0x23   :  { %96 = vrot.lane.b32.xlu1 %v1591_v20, %s1473_s20 }
  0x24   :  { %113 = vrot.lane.b32.xlu0 %v62_v19, %s1474_s21 }
  0x27   :  { %109 = vrot.lane.b32.xlu1 %v1532_v1, %s1474_s21 }
  0x28   :  { %88 = vrot.lane.b32.xlu0 %v1471_v0, %s1473_s20 }
  0x2b   :  { %119 = vrot.lane.b32.xlu1 %v65_v16, %s1474_s21 }
  0x2c   :  { %98 = vrot.lane.b32.xlu0 %v1580_v14, %s1473_s20 }
  0x2f   :  { %132 = vrot.lane.b32.xlu1 %v1570_v9, %s1475_s22 }
  0x30   :  { %117 = vrot.lane.b32.xlu0 %v64_v21, %s1474_s21 }
  0x33   :  { %148 = vrot.lane.b32.xlu1 %v61_v17, %s1476_s23 }
  0x34   :  { %130 = vrot.lane.b32.xlu0 %v1572_v11, %s1475_s22 }
  0x37   :  { %152 = vrot.lane.b32.xlu1 %v63_v15, %s1476_s23 }
  0x38   :  { %134 = vrot.lane.b32.xlu0 %v1576_v13, %s1475_s22 }
  0x3b   :  { %138 = vrot.lane.b32.xlu1 %v1580_v14, %s1475_s22 }
  0x3c   :  { %150 = vrot.lane.b32.xlu0 %v62_v19, %s1476_s23 }
  0x3f   :  { %156 = vrot.lane.b32.xlu1 %v65_v16, %s1476_s23 }
  0x40   :  { %136 = vrot.lane.b32.xlu0 %v1591_v20, %s1475_s22 }
  0x43   :  { %171 = vrot.lane.b32.xlu1 %v1570_v9, %s1477_s24 }
  0x44   :  { %154 = vrot.lane.b32.xlu0 %v64_v21, %s1476_s23 }
  0x47   :  { %190 = vrot.lane.b32.xlu1 %v61_v17, %s1478_s25 }
  0x48   :  { %169 = vrot.lane.b32.xlu0 %v1572_v11, %s1477_s24 }
  0x4b   :  { %194 = vrot.lane.b32.xlu1 %v63_v15, %s1478_s25 }
  0x4c   :  { %173 = vrot.lane.b32.xlu0 %v1576_v13, %s1477_s24 }
  0x4f   :  { %177 = vrot.lane.b32.xlu1 %v1580_v14, %s1477_s24 }
  0x50   :  { %192 = vrot.lane.b32.xlu0 %v62_v19, %s1478_s25 }
  0x53   :  { %198 = vrot.lane.b32.xlu1 %v65_v16, %s1478_s25 }
  0x54   :  { %175 = vrot.lane.b32.xlu0 %v1591_v20, %s1477_s24 }
  0x57   :  { %213 = vrot.lane.b32.xlu1 %v1570_v9, %s1479_s0 }
  0x58   :  { %196 = vrot.lane.b32.xlu0 %v64_v21, %s1478_s25 }
  0x5b   :  { %217 = vrot.lane.b32.xlu1 %v1591_v20, %s1479_s0 }
  0x5c   :  { %211 = vrot.lane.b32.xlu0 %v1572_v11, %s1479_s0 }
  0x5f   :  { %79 = vrot.lane.b32.xlu1 %v66_v25, %s1472_s17 }
  0x60   :  { %215 = vrot.lane.b32.xlu0 %v1576_v13, %s1479_s0 }
  0x63   :  { %121 = vrot.lane.b32.xlu1 %v66_v25, %s1474_s21 }
  0x64   :  { %219 = vrot.lane.b32.xlu0 %v1580_v14, %s1479_s0 }
  0x67   :  { %158 = vrot.lane.b32.xlu1 %v66_v25, %s1476_s23 }
  0x68   :  { %100 = vrot.lane.b32.xlu0 %v1646_v24, %s1473_s20 }
  0x6b   :  { %179 = vrot.lane.b32.xlu1 %v1646_v24, %s1477_s24 }
  0x6c   :  { %140 = vrot.lane.b32.xlu0 %v1646_v24, %s1475_s22 }
  0x6f   :  { %200 = vrot.lane.b32.xlu1 %v66_v25, %s1478_s25 }
  0x70   :  { %160 = vrot.lane.b32.xlu0 %v1532_v1, %s1476_s23 }
  0x73   :  { %221 = vrot.lane.b32.xlu1 %v1646_v24, %s1479_s0 }
  0x74   :  { %181 = vrot.lane.b32.xlu0 %v1471_v0, %s1477_s24 }
  0x75   :  { %v68_v26 = vpop.permute.xlu1 %67 }
  0x78   :  { %202 = vrot.lane.b32.xlu0 %v1532_v1, %s1478_s25 }
  0x7c   :  { %223 = vrot.lane.b32.xlu0 %v1471_v0, %s1479_s0 }
  0x81   :  { %v1678_v27 = vpop.permute.xlu1 %92 }
  0x82   :  { %v91_v28 = vpop.permute.xlu0 %90 }
  0x83   :  { %v104_v43 = vsel %vm102_vm2, %v91_v28, %v1678_v27 }
  0x85   :  { %v74_v29 = vpop.permute.xlu1 %73 }
  0x86   :  { %v1680_v30 = vpop.permute.xlu0 %94 }
  0x87   :  { %v105_v23 = vsel %vm102_vm2, %v1678_v27, %v1680_v30 }
  0x89   :  { %v1682_v31 = vpop.permute.xlu1 %77 }
  0x8a   :  { %v70_v32 = vpop.permute.xlu0 %69 }
  0x8b   :  { %v82_v7 = vsel %vm81_vm0, %v68_v26, %v70_v32 }
  0x8d   :  { %v112_v33 = vpop.permute.xlu1 %111 }
  0x8e   :  { %v72_v34 = vpop.permute.xlu0 %71 }
  0x8f   :  { %v84_v35 = vsel %vm81_vm0, %v72_v34, %v74_v29  ;;  %v83_v61 = vsel %vm81_vm0, %v70_v32, %v72_v34 }
  0x90   :  { %v241_v36 = vsel %vm232_vm1, %v1570_v9, %v84_v35  ;;  %v238_v1 = vsel %vm232_vm1, %v1572_v11, %v83_v61 }
  0x91   :  { %354 = vrot.lane.b32.xlu0 %v241_v36, %s1480_s28  ;;  %v116_v37 = vpop.permute.xlu1 %115 }
  0x92   :  { %v76_v38 = vpop.permute.xlu0 %75 }
  0x93   :  { %v85_v39 = vsel %vm81_vm0, %v74_v29, %v76_v38  ;;  %v86_v15 = vsel %vm81_vm0, %v76_v38, %v1682_v31 }
  0x94   :  { %v244_v40 = vsel %vm232_vm1, %v1576_v13, %v85_v39  ;;  %v235_v13 = vsel %vm232_vm1, 0, %v82_v7  ;;  %v247_v18 = vsel %vm232_vm1, %v1591_v20, %v86_v15 }
  0x95   :  { %356 = vrot.lane.b32.xlu0 %v244_v40, %s1480_s28  ;;  %v97_v41 = vpop.permute.xlu1 %96 }
  0x96   :  { %v114_v42 = vpop.permute.xlu0 %113  ;;  %v106_v34 = vsel %vm102_vm2, %v1680_v30, %v97_v41 }
  0x97   :  { %v125_v44 = vsel %vm123_vm3, %v112_v33, %v114_v42  ;;  %v126_v19 = vsel %vm123_vm3, %v114_v42, %v116_v37 }
  0x98   :  { %v259_v45 = vsel %vm232_vm1, %v104_v43, %v125_v44  ;;  %v262_v29 = vsel %vm232_vm1, %v105_v23, %v126_v19 }
  0x99   :  { %366 = vrot.lane.b32.xlu0 %v259_v45, %s1480_s28  ;;  %v110_v46 = vpop.permute.xlu1 %109 }
  0x9a   :  { %v124_v47 = vsel %vm123_vm3, %v110_v46, %v112_v33  ;;  %v1698_v48 = vpop.permute.xlu0 %88 }
  0x9b   :  { %v103_v49 = vsel %vm102_vm2, %v1698_v48, %v91_v28 }
  0x9c   :  { %v256_v50 = vsel %vm232_vm1, %v103_v49, %v124_v47 }
  0x9d   :  { %364 = vrot.lane.b32.xlu0 %v256_v50, %s1480_s28  ;;  %v1704_v51 = vpop.permute.xlu1 %119 }
  0x9e   :  { %v1706_v52 = vpop.permute.xlu0 %98 }
  0x9f   :  { %v107_v55 = vsel %vm102_vm2, %v97_v41, %v1706_v52 }
  0xa1   :  { %v133_v53 = vpop.permute.xlu1 %132 }
  0xa2   :  { %v118_v54 = vpop.permute.xlu0 %117 }
  0xa3   :  { %v128_v56 = vsel %vm123_vm3, %v118_v54, %v1704_v51  ;;  %v127_v32 = vsel %vm123_vm3, %v116_v37, %v118_v54 }
  0xa4   :  { %v268_v57 = vsel %vm232_vm1, %v107_v55, %v128_v56  ;;  %v265_v35 = vsel %vm232_vm1, %v106_v34, %v127_v32 }
  0xa5   :  { %372 = vrot.lane.b32.xlu0 %v268_v57, %s1480_s28  ;;  %v149_v58 = vpop.permute.xlu1 %148 }
  0xa6   :  { %v131_v59 = vpop.permute.xlu0 %130 }
  0xa7   :  { %v277_v60 = vsel %vm232_vm1, %v131_v59, %v149_v58  ;;  %v143_v37 = vsel %vm142_vm5, %v131_v59, %v133_v53 }
  0xa8   :  { %378 = vrot.lane.b32.xlu1 %v277_v60, %s1480_s28 }
  0xa9   :  { %v153_v62 = vpop.permute.xlu1 %152 }
  0xaa   :  { %v135_v63 = vpop.permute.xlu0 %134 }
  0xab   :  { %v144_v10 = vsel %vm142_vm5, %v133_v53, %v135_v63 }
  0xac   :  { %352 = vrot.lane.b32.xlu1 %v238_v1, %s1480_s28 }
  0xad   :  { %v1721_v8 = vpop.permute.xlu1 %138 }
  0xae   :  { %v151_v9 = vpop.permute.xlu0 %150 }
  0xaf   :  { %v164_v12 = vsel %vm162_vm4, %v151_v9, %v153_v62  ;;  %v163_v36 = vsel %vm162_vm4, %v149_v58, %v151_v9 }
  0xb0   :  { %350 = vrot.lane.b32.xlu1 %v235_v13, %s1480_s28  ;;  %v283_v11 = vsel %vm232_vm1, %v144_v10, %v164_v12  ;;  %v280_v40 = vsel %vm232_vm1, %v143_v37, %v163_v36 }
  0xb1   :  { %382 = vrot.lane.b32.xlu0 %v283_v11, %s1480_s28  ;;  %v1731_v16 = vpop.permute.xlu1 %156 }
  0xb2   :  { %v137_v17 = vpop.permute.xlu0 %136 }
  0xb3   :  { %v145_v26 = vsel %vm142_vm5, %v135_v63, %v137_v17  ;;  %v146_v41 = vsel %vm142_vm5, %v137_v17, %v1721_v8 }
  0xb4   :  { %358 = vrot.lane.b32.xlu1 %v247_v18, %s1480_s28 }
  0xb5   :  { %v172_v21 = vpop.permute.xlu1 %171 }
  0xb6   :  { %v155_v25 = vpop.permute.xlu0 %154 }
  0xb7   :  { %v165_v28 = vsel %vm162_vm4, %v153_v62, %v155_v25  ;;  %v166_v42 = vsel %vm162_vm4, %v155_v25, %v1731_v16 }
  0xb8   :  { %368 = vrot.lane.b32.xlu1 %v262_v29, %s1480_s28  ;;  %v286_v20 = vsel %vm232_vm1, %v145_v26, %v165_v28  ;;  %v289_v46 = vsel %vm232_vm1, %v146_v41, %v166_v42  ;;  %v638_v41 = vld [vmem:[%s2467_s4] sm:$0xff] }
  0xb9   :  { %384 = vrot.lane.b32.xlu0 %v286_v20, %s1480_s28  ;;  %v191_v33 = vpop.permute.xlu1 %190 }
  0xba   :  { %v170_v27 = vpop.permute.xlu0 %169 }
  0xbb   :  { %v184_v44 = vsel %vm183_vm6, %v170_v27, %v172_v21  ;;  %v298_v56 = vsel %vm232_vm1, %v170_v27, %v191_v33 }
  0xbc   :  { %370 = vrot.lane.b32.xlu1 %v265_v35, %s1480_s28 }
  0xbd   :  { %v195_v38 = vpop.permute.xlu1 %194 }
  0xbe   :  { %v174_v39 = vpop.permute.xlu0 %173 }
  0xbf   :  { %v185_v53 = vsel %vm183_vm6, %v172_v21, %v174_v39 }
  0xc0   :  { %380 = vrot.lane.b32.xlu1 %v280_v40, %s1480_s28 }
  0xc1   :  { %v1757_v30 = vpop.permute.xlu1 %177 }
  0xc2   :  { %v193_v43 = vpop.permute.xlu0 %192 }
  0xc3   :  { %v205_v45 = vsel %vm204_vm7, %v191_v33, %v193_v43  ;;  %v206_v47 = vsel %vm204_vm7, %v193_v43, %v195_v38 }
  0xc4   :  { %386 = vrot.lane.b32.xlu1 %v289_v46, %s1480_s28  ;;  %v301_v49 = vsel %vm232_vm1, %v184_v44, %v205_v45  ;;  %v304_v55 = vsel %vm232_vm1, %v185_v53, %v206_v47  ;;  %v663_v46 = vld [vmem:[%s2468_s5 + $0x8] sm:$0xff] }
  0xc5   :  { %394 = vrot.lane.b32.xlu0 %v301_v49, %s1480_s28  ;;  %v199_v50 = vpop.permute.xlu1 %198  ;;  %v639_v49 = vld [vmem:[%s2467_s4 + $0x8] sm:$0xff] }
  0xc6   :  { %v176_v54 = vpop.permute.xlu0 %175 }
  0xc7   :  { %v186_v59 = vsel %vm183_vm6, %v174_v39, %v176_v54  ;;  %v187_v60 = vsel %vm183_vm6, %v176_v54, %v1757_v30 }
  0xc8   :  { %396 = vrot.lane.b32.xlu1 %v304_v55, %s1480_s28 }
  0xc9   :  { %392 = vrot.lane.b32.xlu0 %v298_v56, %s1480_s28  ;;  %v214_v57 = vpop.permute.xlu1 %213 }
  0xca   :  { %v197_v58 = vpop.permute.xlu0 %196 }
  0xcb   :  { %v207_v61 = vsel %vm204_vm7, %v195_v38, %v197_v58  ;;  %v208_v62 = vsel %vm204_vm7, %v197_v58, %v199_v50 }
  0xcc   :  { %v310_v63 = vsel %vm232_vm1, %v187_v60, %v208_v62  ;;  %v307_v1 = vsel %vm232_vm1, %v186_v59, %v207_v61 }
  0xcd   :  { %400 = vrot.lane.b32.xlu0 %v310_v63, %s1480_s28  ;;  %398 = vrot.lane.b32.xlu1 %v307_v1, %s1480_s28  ;;  %v218_v7 = vpop.permute.xlu1 %217 }
  0xce   :  { %v212_v9 = vpop.permute.xlu0 %211 }
  0xcf   :  { %v226_v10 = vsel %vm225_vm8, %v212_v9, %v214_v57 }
  0xd1   :  { %408 = vrot.lane.b32.xlu0 %v226_v10, %s1480_s28  ;;  %406 = vrot.lane.b32.xlu1 %v212_v9, %s1480_s28  ;;  %v80_v12 = vpop.permute.xlu1 %79 }
  0xd2   :  { %v216_v13 = vpop.permute.xlu0 %215  ;;  %v87_v17 = vsel %vm81_vm0, %v1682_v31, %v80_v12  ;;  %v253_v31 = vsel %vm232_vm1, %v1646_v24, %v80_v12 }
  0xd3   :  { %v228_v15 = vsel %vm225_vm8, %v216_v13, %v218_v7  ;;  %v227_v11 = vsel %vm225_vm8, %v214_v57, %v216_v13  ;;  %v250_v23 = vsel %vm232_vm1, %v1580_v14, %v87_v17 }
  0xd5   :  { %412 = vrot.lane.b32.xlu0 %v228_v15, %s1480_s28  ;;  %410 = vrot.lane.b32.xlu1 %v227_v11, %s1480_s28  ;;  %v122_v18 = vpop.permute.xlu1 %121 }
  0xd6   :  { %v220_v19 = vpop.permute.xlu0 %219  ;;  %v129_v28 = vsel %vm123_vm3, %v1704_v51, %v122_v18 }
  0xd7   :  { %v229_v21 = vsel %vm225_vm8, %v218_v7, %v220_v19 }
  0xd9   :  { %360 = vrot.lane.b32.xlu0 %v250_v23, %s1480_s28  ;;  %414 = vrot.lane.b32.xlu1 %v229_v21, %s1480_s28  ;;  %v159_v25 = vpop.permute.xlu1 %158 }
  0xda   :  { %v101_v26 = vpop.permute.xlu0 %100  ;;  %v167_v34 = vsel %vm162_vm4, %v1731_v16, %v159_v25 }
  0xdb   :  { %v108_v29 = vsel %vm102_vm2, %v1706_v52, %v101_v26  ;;  %v274_v33 = vsel %vm232_vm1, %v101_v26, %v122_v18 }
  0xdc   :  { %v271_v32 = vsel %vm232_vm1, %v108_v29, %v129_v28 }
  0xdd   :  { %362 = vrot.lane.b32.xlu1 %v253_v31, %s1480_s28  ;;  %374 = vrot.lane.b32.xlu0 %v271_v32, %s1480_s28  ;;  %v180_v14 = vpop.permute.xlu1 %179 }
  0xde   :  { %v141_v20 = vpop.permute.xlu0 %140  ;;  %v188_v27 = vsel %vm183_vm6, %v1757_v30, %v180_v14 }
  0xdf   :  { %v147_v24 = vsel %vm142_vm5, %v1721_v8, %v141_v20 }
  0xe0   :  { %v292_v51 = vsel %vm232_vm1, %v147_v24, %v167_v34 }
  0xe1   :  { %376 = vrot.lane.b32.xlu1 %v274_v33, %s1480_s28  ;;  %388 = vrot.lane.b32.xlu0 %v292_v51, %s1480_s28  ;;  %v201_v52 = vpop.permute.xlu1 %200 }
  0xe2   :  { %v209_v35 = vsel %vm204_vm7, %v199_v50, %v201_v52  ;;  %v161_v36 = vpop.permute.xlu0 %160  ;;  %v662_v50 = vld [vmem:[%s2468_s5] sm:$0xff] }
  0xe3   :  { %v168_v38 = vsel %vm162_vm4, %v159_v25, %v161_v36  ;;  %v313_v16 = vsel %vm232_vm1, %v188_v27, %v209_v35 }
  0xe4   :  { %v295_v37 = vsel %vm232_vm1, %v141_v20, %v168_v38 }
  0xe5   :  { %402 = vrot.lane.b32.xlu0 %v313_v16, %s1480_s28  ;;  %390 = vrot.lane.b32.xlu1 %v295_v37, %s1480_s28  ;;  %v222_v8 = vpop.permute.xlu1 %221 }
  0xe6   :  { %v1821_v39 = vpop.permute.xlu0 %181  ;;  %v230_v40 = vsel %vm225_vm8, %v220_v19, %v222_v8 }
  0xe7   :  { %v189_v42 = vsel %vm183_vm6, %v180_v14, %v1821_v39 }
  0xe9   :  { %416 = vrot.lane.b32.xlu0 %v230_v40, %s1480_s28 }
  0xea   :  { %v203_v30 = vpop.permute.xlu0 %202 }
  0xeb   :  { %v210_v43 = vsel %vm204_vm7, %v201_v52, %v203_v30 }
  0xec   :  { %v316_v44 = vsel %vm232_vm1, %v189_v42, %v210_v43 }
  0xed   :  { %404 = vrot.lane.b32.xlu1 %v316_v44, %s1480_s28  ;;  %642 = vperm.xlu0 %1429, %v638_v41  }
  0xee   :  { %v1833_v45 = vpop.permute.xlu0 %223 }
  0xef   :  { %v231_v47 = vsel %vm225_vm8, %v222_v8, %v1833_v45  ;;  %v1431_v8 = vld [vmem:[%s2466_s2] sm:$0xff]  }
  0xf1   :  { %418 = vrot.lane.b32.xlu1 %v231_v47, %s1480_s28  ;;  %671 = vperm.xlu0 %1429, %v663_v46  }
  0xf5   :  { %647 = vperm.xlu1 %1430, %v639_v49   ;;  %768 = vrot.lane.b32.xlu0 %v1471_v0, %s1472_s17 }
  0xf9   :  { %666 = vperm.xlu1 %1430, %v662_v50   ;;  %855 = vrot.lane.b32.xlu0 %v1471_v0, %s1476_s23 }
  0xfd   :  { %928 = vrot.lane.b32.xlu0 %v1471_v0, %s1480_s28  ;;  %806 = vrot.lane.b32.xlu1 %v1471_v0, %s1474_s21 }
 0x101   :  { %893 = vrot.lane.b32.xlu0 %v1471_v0, %s1478_s25 }
 0x103   :  { %v355_v53 = vpop.permute.xlu0 %354 }
 0x107   :  { %v357_v55 = vpop.permute.xlu0 %356 }
 0x108   :  { %v423_v1 = vsel %vm420_vm9, %v355_v53, %v357_v55 }
 0x10b   :  { %v367_v58 = vpop.permute.xlu0 %366 }
 0x10f   :  { %v365_v62 = vpop.permute.xlu0 %364 }
 0x110   :  { %v427_v12 = vsel %vm420_vm9, %v365_v62, %v367_v58 }
 0x117   :  { %v1864_v9 = vpop.permute.xlu0 %372 }
 0x11a   :  { %v379_v54 = vpop.permute.xlu1 %378 }
 0x11e   :  { %v353_v56 = vpop.permute.xlu1 %352 }
 0x11f   :  { %v422_v57 = vsel %vm420_vm9, %v353_v56, %v355_v53 }
 0x120   :  { %497 = vmatprep.subr.bf16.mxu0 %v422_v57 }
 0x122   :  { %v351_v59 = vpop.permute.xlu1 %350 }
 0x123   :  { %v421_v60 = vsel %vm420_vm9, %v351_v59, %v353_v56  ;;  %v383_v15 = vpop.permute.xlu0 %382 }
 0x124   :  { %498 = vmatpush1.bf16.msra.mxu0 %v421_v60 }
 0x126   :  { %v1859_v61 = vpop.permute.xlu1 %358 }
 0x127   :  { %v424_v63 = vsel %vm420_vm9, %v357_v55, %v1859_v61 }
 0x128   :  { %540 = vmatprep.subr.bf16.mxu1 %v424_v63 }
 0x129   :  { %541 = vmatpush1.bf16.msra.mxu1 %v423_v1 }
 0x12a   :  { %v369_v7 = vpop.permute.xlu1 %368 }
 0x12b   :  { %v428_v10 = vsel %vm420_vm9, %v367_v58, %v369_v7  ;;  %v385_v19 = vpop.permute.xlu0 %384 }
 0x12c   :  { %499 = vmatprep.subr.bf16.mxu0 %v428_v10  ;;  %v435_v28 = vsel %vm420_vm9, %v383_v15, %v385_v19  ;;  %v712_v10 = vlaneseq }
 0x12d   :  { %500 = vmatpush1.bf16.msra.mxu0 %v427_v12 }
 0x12e   :  { %v371_v13 = vpop.permute.xlu1 %370  ;;  %v1908_v12 = vshrl.u32 %v712_v10, 7 }
 0x12f   :  { %v430_v11 = vsel %vm420_vm9, %v371_v13, %v1864_v9  ;;  %v429_v17 = vsel %vm420_vm9, %v369_v7, %v371_v13 }
 0x130   :  { %542 = vmatprep.subr.bf16.mxu1 %v430_v11  ;;  %v730_v13 = vsub.s32 4, %v1908_v12 }
 0x131   :  { %543 = vmatpush1.bf16.msra.mxu1 %v429_v17  ;;  %v734_v17 = vsub.s32 5, %v1908_v12 }
 0x132   :  { %v381_v18 = vpop.permute.xlu1 %380 }
 0x133   :  { %v434_v21 = vsel %vm420_vm9, %v381_v18, %v383_v15  ;;  %v433_v23 = vsel %vm420_vm9, %v379_v54, %v381_v18  ;;  %v1914_v15 = vld [vmem:[%s2469_s1] sm:$0x3f] }
 0x134   :  { %501 = vmatprep.subr.bf16.mxu0 %v434_v21  ;;  %v1917_v11 = vrot.slane %v1914_v15, %v730_v13  ;;  %v1921_v18 = vrot.slane %v1914_v15, %v734_v17 }
 0x135   :  { %502 = vmatpush1.bf16.msra.mxu0 %v433_v23 }
 0x136   :  { %v387_v25 = vpop.permute.xlu1 %386 }
 0x137   :  { %v395_v26 = vpop.permute.xlu0 %394  ;;  %v436_v31 = vsel %vm420_vm9, %v385_v19, %v387_v25 }
 0x138   :  { %544 = vmatprep.subr.bf16.mxu1 %v436_v31 }
 0x139   :  { %545 = vmatpush1.bf16.msra.mxu1 %v435_v28 }
 0x13a   :  { %v397_v29 = vpop.permute.xlu1 %396 }
 0x13b   :  { %v393_v32 = vpop.permute.xlu0 %392  ;;  %v440_v14 = vsel %vm420_vm9, %v395_v26, %v397_v29 }
 0x13c   :  { %503 = vmatprep.subr.bf16.mxu0 %v440_v14  ;;  %v439_v20 = vsel %vm420_vm9, %v393_v32, %v395_v26 }
 0x13d   :  { %504 = vmatpush1.bf16.msra.mxu0 %v439_v20 }
 0x13f   :  { %v399_v33 = vpop.permute.xlu1 %398  ;;  %v401_v34 = vpop.permute.xlu0 %400 }
 0x140   :  { %v442_v24 = vsel %vm420_vm9, %v399_v33, %v401_v34  ;;  %v441_v51 = vsel %vm420_vm9, %v397_v29, %v399_v33 }
 0x141   :  { %546 = vmatprep.subr.bf16.mxu1 %v442_v24 }
 0x142   :  { %547 = vmatpush1.bf16.msra.mxu1 %v441_v51 }
 0x143   :  { %v407_v52 = vpop.permute.xlu1 %406  ;;  %v409_v27 = vpop.permute.xlu0 %408 }
 0x144   :  { %v445_v35 = vsel %vm420_vm9, %v407_v52, %v409_v27 }
 0x145   :  { %v480_v37 = vsel %vm232_vm1, %v445_v35, 0 }
 0x147   :  { %v411_v36 = vpop.permute.xlu1 %410  ;;  %v413_v38 = vpop.permute.xlu0 %412 }
 0x148   :  { %v446_v16 = vsel %vm420_vm9, %v409_v27, %v411_v36  ;;  %v447_v40 = vsel %vm420_vm9, %v411_v36, %v413_v38 }
 0x149   :  { %1408 = vmatprep.subr.msk.bf16.mxu0 %vm232_vm1, %v446_v16  ;;  %v486_v43 = vsel %vm232_vm1, %v447_v40, 0 }
 0x14a   :  { %506 = vmatpush1.bf16.msra.mxu0 %v480_v37 }
 0x14b   :  { %v415_v42 = vpop.permute.xlu1 %414  ;;  %v361_v30 = vpop.permute.xlu0 %360 }
 0x14c   :  { %v448_v41 = vsel %vm420_vm9, %v413_v38, %v415_v42  ;;  %v425_v49 = vsel %vm420_vm9, %v1859_v61, %v361_v30 }
 0x14d   :  { %1409 = vmatmul.mubr.msk.bf16.vlgmr.msra.gmra.mrb[0].mxu0 %vm475_vm10, %v1431_v8  ;;  %1410 = vmatprep.subr.msk.bf16.mxu1 %vm232_vm1, %v448_v41 }
 0x14e   :  { %549 = vmatpush1.bf16.msra.mxu1 %v486_v43  ;;  %615 = vmatprep.mubr.bf16.mxu0 %v1471_v0 }
 0x14f   :  { %v363_v44 = vpop.permute.xlu1 %362  ;;  %v375_v46 = vpop.permute.xlu0 %374 }
 0x150   :  { %v426_v47 = vsel %vm420_vm9, %v361_v30, %v363_v44  ;;  %v431_v55 = vsel %vm420_vm9, %v1864_v9, %v375_v46  ;;  %v714_v44 = vsub.s32 0, %v1908_v12 }
 0x151   :  { %1411 = vmatmul.mubr.msk.bf16.vlgmr.msra.gmra.mrb[0].mxu1 %vm475_vm10, %v1431_v8  ;;  %583 = vmatprep.subr.bf16.mxu0 %v426_v47 }
 0x152   :  { %584 = vmatpush1.bf16.msra.mxu0 %v425_v49 }
 0x153   :  { %v377_v50 = vpop.permute.xlu1 %376  ;;  %v389_v53 = vpop.permute.xlu0 %388 }
 0x154   :  { %v432_v54 = vsel %vm420_vm9, %v375_v46, %v377_v50  ;;  %v437_v58 = vsel %vm420_vm9, %v387_v25, %v389_v53  ;;  %v722_v46 = vsub.s32 2, %v1908_v12 }
 0x155   :  { %585 = vmatprep.subr.bf16.mxu0 %v432_v54 }
 0x156   :  { %586 = vmatpush1.bf16.msra.mxu0 %v431_v55  ;;  %v723_v54 = vrot.slane %v1914_v15, %v722_v46 }
 0x157   :  { %v391_v0 = vpop.permute.xlu1 %390  ;;  %v403_v57 = vpop.permute.xlu0 %402 }
 0x158   :  { %v438_v56 = vsel %vm420_vm9, %v389_v53, %v391_v0  ;;  %v443_v62 = vsel %vm420_vm9, %v401_v34, %v403_v57 }
 0x159   :  { %587 = vmatprep.subr.bf16.mxu0 %v438_v56 }
 0x15a   :  { %588 = vmatpush1.bf16.msra.mxu0 %v437_v58 }
 0x15b   :  { %v417_v59 = vpop.permute.xlu0 %416 }
 0x15c   :  { %v449_v63 = vsel %vm420_vm9, %v415_v42, %v417_v59 }
 0x15d   :  { %v492_v9 = vsel %vm232_vm1, %v449_v63, 0 }
 0x15f   :  { %v405_v60 = vpop.permute.xlu1 %404 }
 0x160   :  { %v444_v61 = vsel %vm420_vm9, %v403_v57, %v405_v60 }
 0x161   :  { %589 = vmatprep.subr.bf16.mxu0 %v444_v61 }
 0x162   :  { %590 = vmatpush1.bf16.msra.mxu0 %v443_v62 }
 0x163   :  { %v419_v1 = vpop.permute.xlu1 %418 }
 0x164   :  { %v450_v7 = vsel %vm420_vm9, %v417_v59, %v419_v1 }
 0x165   :  { %1412 = vmatprep.subr.msk.bf16.mxu0 %vm232_vm1, %v450_v7 }
 0x166   :  { %592 = vmatpush1.bf16.msra.mxu0 %v492_v9 }
 0x169   :  { %1413 = vmatmul.mubr.msk.bf16.vlgmr.msra.gmra.mrb[4].mxu0 %vm475_vm10, %v1431_v8 }
 0x16c   :  { %v1925_v21 = vpop.permute.xlu0 %642 }
 0x170   :  { %v1932_v52 = vpop.permute.xlu0 %671 }
 0x174   :  { %v1923_v19 = vpop.permute.xlu1 %647 }
 0x178   :  { %v1928_v14 = vpop.permute.xlu1 %666 }
 0x220   :  { %v531_v23 = vpop.f32.mrb[0].mxu0 }
 0x221   :  { %v626_v25 = vmax.f32 %v531_v23, 0.0  ;;  %v533_v26 = vpop.f32.mrb[1].mxu0 }
 0x222   :  { %v535_v31 = vpop.f32.mrb[2].mxu0  ;;  %v627_v61 = vmax.f32 %v533_v26, 0.0 }
 0x223   :  { %v650_v28 = vmul.f32 %v1925_v21, %v626_v25  ;;  %v632_v29 = vmax.f32 %v535_v31, 0.0  ;;  %v537_v32 = vpop.f32.mrb[3].mxu0 }
 0x224   :  { %v574_v20 = vpop.f32.mrb[0].mxu1  ;;  %v633_v58 = vmax.f32 %v537_v32, 0.0  ;;  %v651_v9 = vmul.f32 %v1925_v21, %v627_v61 }
 0x225   :  { %v674_v33 = vadd.f32 %v1928_v14, %v650_v28  ;;  %v656_v34 = vmul.f32 %v1923_v19, %v632_v29  ;;  %v628_v24 = vmax.f32 %v574_v20, 0.0  ;;  %v576_v51 = vpop.f32.mrb[1].mxu1 }
 0x226   :  { %v578_v27 = vpop.f32.mrb[2].mxu1  ;;  %v657_v1 = vmul.f32 %v1923_v19, %v633_v58  ;;  %v675_v13 = vadd.f32 %v1928_v14, %v651_v9  ;;  %v629_v26 = vmax.f32 %v576_v51, 0.0 }
 0x227   :  { %v1935_v35 = vadd.f32 %v674_v33, %v1542_v3  ;;  %v680_v36 = vadd.f32 %v1932_v52, %v656_v34  ;;  %v652_v38 = vmul.f32 %v1925_v21, %v628_v24  ;;  %v634_v16 = vmax.f32 %v578_v27, 0.0  ;;  %v580_v37 = vpop.f32.mrb[3].mxu1 }
 0x228   :  { %v681_v10 = vadd.f32 %v1932_v52, %v657_v1  ;;  %v1979_v23 = vadd.f32 %v675_v13, %v1537_v2  ;;  %v635_v25 = vmax.f32 %v580_v37, 0.0  ;;  %v653_v28 = vmul.f32 %v1925_v21, %v629_v26 }
 0x229   :  { %1447 = vtanh.f32 %v1935_v35  ;;  %v1941_v8 = vadd.f32 %v680_v36, %v1542_v3  ;;  %v676_v40 = vadd.f32 %v1928_v14, %v652_v38  ;;  %v658_v42 = vmul.f32 %v1923_v19, %v634_v16 }
 0x22a   :  { %v715_v3 = vrot.slane %v1914_v15, %v714_v44  ;;  %v1976_v17 = vadd.f32 %v681_v10, %v1537_v2  ;;  %v659_v31 = vmul.f32 %v1923_v19, %v635_v25  ;;  %v718_v2 = vsub.s32 1, %v1908_v12 }
 0x22b   :  { %1449 = vtanh.f32 %v1941_v8  ;;  %v1947_v30 = vadd.f32 %v676_v40, %v1547_v4  ;;  %v682_v41 = vadd.f32 %v1932_v52, %v658_v42  ;;  %v677_v20 = vadd.f32 %v1928_v14, %v653_v28 }
 0x22c   :  { %v683_v29 = vadd.f32 %v1932_v52, %v659_v31  ;;  %v719_v33 = vrot.slane %v1914_v15, %v718_v2  ;;  %v726_v42 = vsub.s32 3, %v1908_v12 }
 0x22d   :  { %1451 = vtanh.f32 %v1947_v30  ;;  %v1952_v43 = vadd.f32 %v682_v41, %v1547_v4  ;;  %v2001_v27 = vadd.f32 %v677_v20, %v1567_v6 }
 0x22e   :  { %v1998_v24 = vadd.f32 %v683_v29, %v1567_v6  ;;  %v727_v46 = vrot.slane %v1914_v15, %v726_v42 }
 0x22f   :  { %1453 = vtanh.f32 %v1952_v43 }
 0x230   :  { %1455 = vtanh.f32 %v1976_v17 }
 0x231   :  { %1457 = vtanh.f32 %v1979_v23 }
 0x232   :  { %1459 = vtanh.f32 %v1998_v24 }
 0x233   :  { %v1448_v47 = vpop.eup %1447  ;;  %1461 = vtanh.f32 %v2001_v27 }
 0x234   :  { %v742_v50 = vmul.f32 %v1448_v47, %v715_v3 }
 0x235   :  { %v1450_v49 = vpop.eup %1449 }
 0x236   :  { %v748_v53 = vmul.f32 %v1450_v49, %v715_v3 }
 0x237   :  { %v1452_v55 = vpop.eup %1451 }
 0x238   :  { %v754_v0 = vpack.c.bf16 %v748_v53, %v742_v50  ;;  %v744_v57 = vmul.f32 %v1452_v55, %v723_v54 }
 0x239   :  { %v1454_v56 = vpop.eup %1453 }
 0x23a   :  { %v750_v4 = vmul.f32 %v1454_v56, %v723_v54  ;;  %808 = vrot.lane.b32.xlu0 %v754_v0, %s1474_s21  ;;  %770 = vrot.lane.b32.xlu1 %v754_v0, %s1472_s17  ;;  %v1456_v32 = vpop.eup %1455 }
 0x23b   :  { %v1458_v34 = vpop.eup %1457  ;;  %v749_v51 = vmul.f32 %v1456_v32, %v719_v33 }
 0x23c   :  { %v756_v59 = vpack.c.bf16 %v750_v4, %v744_v57  ;;  %v617_v60 = vpop.f32.mrb[4].mxu0  ;;  %v743_v36 = vmul.f32 %v1458_v34, %v719_v33  ;;  %v1460_v44 = vpop.eup %1459 }
 0x23d   :  { %v1961_v62 = vpop.f32.mrb[5].mxu0  ;;  %v630_v37 = vmax.f32 %v617_v60, 0.0  ;;  %v1462_v47 = vpop.eup %1461  ;;  %v751_v12 = vmul.f32 %v1460_v44, %v727_v46 }
 0x23e   :  { %v621_v63 = vpop.f32.mrb[6].mxu0  ;;  %812 = vrot.lane.b32.xlu0 %v756_v59, %s1474_s21  ;;  %774 = vrot.lane.b32.xlu1 %v756_v59, %s1472_s17  ;;  %v755_v16 = vpack.c.bf16 %v749_v51, %v743_v36  ;;  %v745_v53 = vmul.f32 %v1462_v47, %v727_v46  ;;  %v631_v55 = vmax.f32 %v1961_v62, 0.0 }
 0x23f   :  { %v1966_v7 = vpop.f32.mrb[7].mxu0  ;;  %v636_v38 = vmax.f32 %v621_v63, 0.0  ;;  %v654_v6 = vmul.f32 %v1925_v21, %v630_v37  ;;  %v769_v63 = vpop.permute.xlu0 %768 }
 0x240   :  { %v757_v15 = vpack.c.bf16 %v751_v12, %v745_v53  ;;  %v637_v54 = vmax.f32 %v1966_v7, 0.0  ;;  %v655_v56 = vmul.f32 %v1925_v21, %v631_v55  ;;  %v807_v7 = vpop.permute.xlu1 %806 }
 0x241   :  { %v660_v40 = vmul.f32 %v1923_v19, %v636_v38  ;;  %v678_v3 = vadd.f32 %v1928_v14, %v654_v6 }
 0x242   :  { %826 = vrot.lane.b32.xlu0 %v754_v0, %s1475_s22  ;;  %788 = vrot.lane.b32.xlu1 %v754_v0, %s1473_s20 }
 0x243   :  { %v684_v41 = vadd.f32 %v1932_v52, %v660_v40  ;;  %v2023_v50 = vadd.f32 %v678_v3, %v1555_v5  ;;  %v2071_v1 = vpop.permute.xlu0 %855 }
 0x245   :  { %v2020_v49 = vadd.f32 %v684_v41, %v1555_v5  ;;  %v661_v5 = vmul.f32 %v1923_v19, %v637_v54 }
 0x246   :  { %830 = vrot.lane.b32.xlu0 %v756_v59, %s1475_s22  ;;  %792 = vrot.lane.b32.xlu1 %v756_v59, %s1473_s20 }
 0x247   :  { %1463 = vtanh.f32 %v2020_v49  ;;  %v685_v4 = vadd.f32 %v1932_v52, %v661_v5 }
 0x248   :  { %1465 = vtanh.f32 %v2023_v50 }
 0x249   :  { %v2046_v19 = vadd.f32 %v685_v4, %v1630_v22 }
 0x24a   :  { %863 = vrot.lane.b32.xlu0 %v754_v0, %s1477_s24  ;;  %843 = vrot.lane.b32.xlu1 %v754_v0, %s1476_s23 }
 0x24b   :  { %1467 = vtanh.f32 %v2046_v19 }
 0x24e   :  { %867 = vrot.lane.b32.xlu0 %v756_v59, %s1477_s24  ;;  %847 = vrot.lane.b32.xlu1 %v756_v59, %s1476_s23 }
 0x252   :  { %901 = vrot.lane.b32.xlu0 %v754_v0, %s1479_s0  ;;  %881 = vrot.lane.b32.xlu1 %v754_v0, %s1478_s25 }
 0x256   :  { %905 = vrot.lane.b32.xlu0 %v756_v59, %s1479_s0  ;;  %885 = vrot.lane.b32.xlu1 %v756_v59, %s1478_s25 }
 0x25a   :  { %934 = vrot.lane.b32.xlu0 %v756_v59, %s1480_s28  ;;  %930 = vrot.lane.b32.xlu1 %v754_v0, %s1480_s28  ;;  %v1464_v0 = vpop.eup %1463  ;;  %v679_v59 = vadd.f32 %v1928_v14, %v655_v56 }
 0x25b   :  { %v1466_v57 = vpop.eup %1465  ;;  %v752_v58 = vmul.f32 %v1464_v0, %v1917_v11 }
 0x25c   :  { %v746_v60 = vmul.f32 %v1466_v57, %v1917_v11  ;;  %v2049_v61 = vadd.f32 %v679_v59, %v1630_v22  ;;  %v1468_v11 = vpop.eup %1467 }
 0x25d   :  { %v753_v14 = vmul.f32 %v1468_v11, %v1921_v18 }
 0x25e   :  { %772 = vrot.lane.b32.xlu0 %v755_v16, %s1472_s17  ;;  %810 = vrot.lane.b32.xlu1 %v755_v16, %s1474_s21  ;;  %v758_v21 = vpack.c.bf16 %v752_v58, %v746_v60  ;;  %1469 = vtanh.f32 %v2049_v61 }
 0x262   :  { %790 = vrot.lane.b32.xlu0 %v755_v16, %s1473_s20  ;;  %828 = vrot.lane.b32.xlu1 %v755_v16, %s1475_s22 }
 0x266   :  { %845 = vrot.lane.b32.xlu0 %v755_v16, %s1476_s23  ;;  %865 = vrot.lane.b32.xlu1 %v755_v16, %s1477_s24 }
 0x268   :  { %v1470_v22 = vpop.eup %1469 }
 0x269   :  { %v747_v52 = vmul.f32 %v1470_v22, %v1921_v18  ;;  %v2075_v18 = vpop.permute.xlu0 %928 }
 0x26a   :  { %883 = vrot.lane.b32.xlu0 %v755_v16, %s1478_s25  ;;  %903 = vrot.lane.b32.xlu1 %v755_v16, %s1479_s0 }
 0x26b   :  { %v759_v62 = vpack.c.bf16 %v753_v14, %v747_v52  ;;  %v2148_v52 = vld [vmem:[%s2470_s3 + $0x4] ss:$8 sps:$4 sm:$0xff]  }
 0x26c   :  { %1416 = vmatprep.mubr.msk.bf16.mxu1 %vm1162_vm11, %v2148_v52  ;;  %1417 = vmatprep.mubr.msk.bf16.mxu0 %vm1162_vm11, %v2148_v52 }
 0x26d   :  { %v2079_v9 = vpop.permute.xlu0 %893 }
 0x26e   :  { %794 = vrot.lane.b32.xlu0 %v757_v15, %s1473_s20  ;;  %776 = vrot.lane.b32.xlu1 %v757_v15, %s1472_s17 }
 0x272   :  { %832 = vrot.lane.b32.xlu0 %v757_v15, %s1475_s22  ;;  %814 = vrot.lane.b32.xlu1 %v757_v15, %s1474_s21 }
 0x276   :  { %932 = vrot.lane.b32.xlu0 %v755_v16, %s1480_s28  ;;  %849 = vrot.lane.b32.xlu1 %v757_v15, %s1476_s23 }
 0x27a   :  { %907 = vrot.lane.b32.xlu0 %v757_v15, %s1479_s0  ;;  %869 = vrot.lane.b32.xlu1 %v757_v15, %s1477_s24 }
 0x27e   :  { %778 = vrot.lane.b32.xlu0 %v758_v21, %s1472_s17  ;;  %887 = vrot.lane.b32.xlu1 %v757_v15, %s1478_s25 }
 0x282   :  { %816 = vrot.lane.b32.xlu0 %v758_v21, %s1474_s21  ;;  %936 = vrot.lane.b32.xlu1 %v757_v15, %s1480_s28 }
 0x286   :  { %851 = vrot.lane.b32.xlu0 %v758_v21, %s1476_s23  ;;  %796 = vrot.lane.b32.xlu1 %v758_v21, %s1473_s20 }
 0x28a   :  { %871 = vrot.lane.b32.xlu0 %v758_v21, %s1477_s24  ;;  %834 = vrot.lane.b32.xlu1 %v758_v21, %s1475_s22 }
 0x28e   :  { %889 = vrot.lane.b32.xlu0 %v758_v21, %s1478_s25  ;;  %909 = vrot.lane.b32.xlu1 %v758_v21, %s1479_s0 }
 0x292   :  { %938 = vrot.lane.b32.xlu0 %v758_v21, %s1480_s28  ;;  %780 = vrot.lane.b32.xlu1 %v759_v62, %s1472_s17 }
 0x296   :  { %798 = vrot.lane.b32.xlu0 %v759_v62, %s1473_s20  ;;  %818 = vrot.lane.b32.xlu1 %v759_v62, %s1474_s21 }
 0x29a   :  { %836 = vrot.lane.b32.xlu0 %v759_v62, %s1475_s22  ;;  %853 = vrot.lane.b32.xlu1 %v759_v62, %s1476_s23 }
 0x29e   :  { %911 = vrot.lane.b32.xlu0 %v759_v62, %s1479_s0  ;;  %873 = vrot.lane.b32.xlu1 %v759_v62, %s1477_s24 }
 0x2a2   :  { %891 = vrot.lane.b32.xlu1 %v759_v62, %s1478_s25 }
 0x2a6   :  { %940 = vrot.lane.b32.xlu1 %v759_v62, %s1480_s28 }
 0x2ac   :  { %v771_v10 = vpop.permute.xlu1 %770  ;;  %v809_v13 = vpop.permute.xlu0 %808 }
 0x2ad   :  { %v820_v37 = vsel %vm123_vm3, %v807_v7, %v809_v13  ;;  %v782_v40 = vsel %vm81_vm0, %v769_v63, %v771_v10 }
 0x2b0   :  { %v2081_v25 = vpop.permute.xlu1 %774  ;;  %v2083_v26 = vpop.permute.xlu0 %812 }
 0x2b4   :  { %v789_v31 = vpop.permute.xlu1 %788  ;;  %v827_v28 = vpop.permute.xlu0 %826 }
 0x2b5   :  { %984 = vrot.lane.b32.xlu1 %v827_v28, %s1480_s28  ;;  %v800_v41 = vsel %vm102_vm2, %v1698_v48, %v789_v31 }
 0x2b8   :  { %v2086_v2 = vpop.permute.xlu1 %792  ;;  %v2088_v29 = vpop.permute.xlu0 %830 }
 0x2bc   :  { %v844_v32 = vpop.permute.xlu1 %843  ;;  %v864_v20 = vpop.permute.xlu0 %863 }
 0x2bd   :  { %998 = vrot.lane.b32.xlu0 %v844_v32, %s1480_s28  ;;  %1012 = vrot.lane.b32.xlu1 %v864_v20, %s1480_s28 }
 0x2c0   :  { %v2092_v33 = vpop.permute.xlu1 %847  ;;  %v2094_v34 = vpop.permute.xlu0 %867 }
 0x2c4   :  { %v882_v51 = vpop.permute.xlu1 %881  ;;  %v2096_v36 = vpop.permute.xlu0 %901 }
 0x2c5   :  { %1026 = vrot.lane.b32.xlu0 %v882_v51, %s1480_s28  ;;  %1040 = vrot.lane.b32.xlu1 %v2096_v36, %s1480_s28 }
 0x2c8   :  { %v2101_v38 = vpop.permute.xlu1 %885  ;;  %v2103_v16 = vpop.permute.xlu0 %905 }
 0x2c9   :  { %970 = vrot.lane.b32.xlu0 %v820_v37, %s1480_s28  ;;  %942 = vrot.lane.b32.xlu1 %v782_v40, %s1480_s28 }
 0x2cc   :  { %v931_v6 = vpop.permute.xlu1 %930  ;;  %v2109_v42 = vpop.permute.xlu0 %934 }
 0x2cd   :  { %956 = vrot.lane.b32.xlu1 %v800_v41, %s1480_s28 }
 0x2d0   :  { %v811_v44 = vpop.permute.xlu1 %810  ;;  %v773_v3 = vpop.permute.xlu0 %772 }
 0x2d1   :  { %v783_v46 = vsel %vm81_vm0, %v771_v10, %v773_v3  ;;  %v784_v47 = vsel %vm81_vm0, %v773_v3, %v2081_v25  ;;  %v822_v5 = vsel %vm123_vm3, %v811_v44, %v2083_v26  ;;  %v821_v0 = vsel %vm123_vm3, %v809_v13, %v811_v44 }
 0x2d2   :  { %946 = vrot.lane.b32.xlu0 %v784_v47, %s1480_s28  ;;  %944 = vrot.lane.b32.xlu1 %v783_v46, %s1480_s28 }
 0x2d4   :  { %v829_v12 = vpop.permute.xlu1 %828  ;;  %v791_v53 = vpop.permute.xlu0 %790 }
 0x2d5   :  { %v801_v15 = vsel %vm102_vm2, %v789_v31, %v791_v53  ;;  %v802_v48 = vsel %vm102_vm2, %v791_v53, %v2086_v2  ;;  %v838_v4 = vsel %vm142_vm5, %v827_v28, %v829_v12  ;;  %v839_v58 = vsel %vm142_vm5, %v829_v12, %v2088_v29 }
 0x2d6   :  { %960 = vrot.lane.b32.xlu1 %v802_v48, %s1480_s28  ;;  %958 = vrot.lane.b32.xlu0 %v801_v15, %s1480_s28 }
 0x2d8   :  { %v866_v54 = vpop.permute.xlu1 %865  ;;  %v846_v55 = vpop.permute.xlu0 %845 }
 0x2d9   :  { %v857_v21 = vsel %vm162_vm4, %v844_v32, %v846_v55  ;;  %v858_v11 = vsel %vm162_vm4, %v846_v55, %v2092_v33  ;;  %v875_v62 = vsel %vm183_vm6, %v864_v20, %v866_v54  ;;  %v876_v63 = vsel %vm183_vm6, %v866_v54, %v2094_v34 }
 0x2da   :  { %974 = vrot.lane.b32.xlu1 %v822_v5, %s1480_s28  ;;  %972 = vrot.lane.b32.xlu0 %v821_v0, %s1480_s28  ;;  %v1054_v32 = vsel %vm420_vm9, %v2075_v18, %v931_v6 }
 0x2dc   :  { %v904_v56 = vpop.permute.xlu1 %903  ;;  %v884_v57 = vpop.permute.xlu0 %883 }
 0x2dd   :  { %v895_v13 = vsel %vm204_vm7, %v882_v51, %v884_v57  ;;  %v896_v31 = vsel %vm204_vm7, %v884_v57, %v2101_v38  ;;  %v913_v51 = vsel %vm225_vm8, %v2096_v36, %v904_v56  ;;  %v914_v40 = vsel %vm225_vm8, %v904_v56, %v2103_v16 }
 0x2de   :  { %986 = vrot.lane.b32.xlu1 %v838_v4, %s1480_s28  ;;  %988 = vrot.lane.b32.xlu0 %v839_v58, %s1480_s28 }
 0x2e0   :  { %v777_v59 = vpop.permute.xlu1 %776  ;;  %v2134_v60 = vpop.permute.xlu0 %794 }
 0x2e1   :  { %v785_v18 = vsel %vm81_vm0, %v2081_v25, %v777_v59  ;;  %v803_v46 = vsel %vm102_vm2, %v2086_v2, %v2134_v60 }
 0x2e2   :  { %1002 = vrot.lane.b32.xlu1 %v858_v11, %s1480_s28  ;;  %1000 = vrot.lane.b32.xlu0 %v857_v21, %s1480_s28 }
 0x2e4   :  { %v2141_v22 = vpop.permute.xlu1 %814  ;;  %v2143_v14 = vpop.permute.xlu0 %832 }
 0x2e5   :  { %v823_v15 = vsel %vm123_vm3, %v2083_v26, %v2141_v22  ;;  %v840_v54 = vsel %vm142_vm5, %v2088_v29, %v2143_v14 }
 0x2e6   :  { %1014 = vrot.lane.b32.xlu1 %v875_v62, %s1480_s28  ;;  %1016 = vrot.lane.b32.xlu0 %v876_v63, %s1480_s28 }
 0x2e8   :  { %v2159_v7 = vpop.permute.xlu1 %849  ;;  %v933_v10 = vpop.permute.xlu0 %932 }
 0x2e9   :  { %v1055_v28 = vsel %vm420_vm9, %v931_v6, %v933_v10  ;;  %v1056_v12 = vsel %vm420_vm9, %v933_v10, %v2109_v42  ;;  %v859_v5 = vsel %vm162_vm4, %v2092_v33, %v2159_v7 }
 0x2ea   :  { %1030 = vrot.lane.b32.xlu1 %v896_v31, %s1480_s28  ;;  %1028 = vrot.lane.b32.xlu0 %v895_v13, %s1480_s28 }
 0x2eb   :  { %1166 = vmatprep.subr.bf16.mxu1 %v1055_v28 }
 0x2ec   :  { %1167 = vmatpush1.bf16.msra.mxu1 %v1054_v32  ;;  %v2169_v20 = vpop.permute.xlu1 %869  ;;  %v2171_v37 = vpop.permute.xlu0 %907 }
 0x2ed   :  { %v877_v56 = vsel %vm183_vm6, %v2094_v34, %v2169_v20  ;;  %v915_v4 = vsel %vm225_vm8, %v2103_v16, %v2171_v37 }
 0x2ee   :  { %1042 = vrot.lane.b32.xlu1 %v913_v51, %s1480_s28  ;;  %1044 = vrot.lane.b32.xlu0 %v914_v40, %s1480_s28 }
 0x2f0   :  { %v2179_v41 = vpop.permute.xlu1 %887  ;;  %v779_v44 = vpop.permute.xlu0 %778 }
 0x2f1   :  { %v786_v6 = vsel %vm81_vm0, %v777_v59, %v779_v44  ;;  %v897_v57 = vsel %vm204_vm7, %v2101_v38, %v2179_v41 }
 0x2f2   :  { %948 = vrot.lane.b32.xlu0 %v785_v18, %s1480_s28  ;;  %950 = vrot.lane.b32.xlu1 %v786_v6, %s1480_s28 }
 0x2f4   :  { %v937_v36 = vpop.permute.xlu1 %936  ;;  %v817_v3 = vpop.permute.xlu0 %816 }
 0x2f5   :  { %v1057_v47 = vsel %vm420_vm9, %v2109_v42, %v937_v36  ;;  %v824_v58 = vsel %vm123_vm3, %v2141_v22, %v817_v3 }
 0x2f6   :  { %1209 = vmatprep.subr.bf16.mxu0 %v1057_v47  ;;  %962 = vrot.lane.b32.xlu0 %v803_v46, %s1480_s28 }
 0x2f7   :  { %1210 = vmatpush1.bf16.msra.mxu0 %v1056_v12 }
 0x2f8   :  { %v797_v25 = vpop.permute.xlu1 %796  ;;  %v852_v53 = vpop.permute.xlu0 %851 }
 0x2f9   :  { %v804_v33 = vsel %vm102_vm2, %v2134_v60, %v797_v25  ;;  %v860_v10 = vsel %vm162_vm4, %v2159_v7, %v852_v53 }
 0x2fa   :  { %976 = vrot.lane.b32.xlu0 %v823_v15, %s1480_s28  ;;  %v1308_v15 = vld [vmem:[%s2471_s6 + $0x8] sm:$0xff] }
 0x2fc   :  { %v835_v48 = vpop.permute.xlu1 %834  ;;  %v872_v2 = vpop.permute.xlu0 %871 }
 0x2fd   :  { %v841_v16 = vsel %vm142_vm5, %v2143_v14, %v835_v48  ;;  %v878_v13 = vsel %vm183_vm6, %v2169_v20, %v872_v2 }
 0x2fe   :  { %990 = vrot.lane.b32.xlu0 %v840_v54, %s1480_s28 }
 0x300   :  { %v910_v42 = vpop.permute.xlu1 %909  ;;  %v890_v55 = vpop.permute.xlu0 %889 }
 0x301   :  { %v898_v32 = vsel %vm204_vm7, %v2179_v41, %v890_v55  ;;  %v916_v20 = vsel %vm225_vm8, %v2171_v37, %v910_v42  ;;  %v1307_v41 = vld [vmem:[%s2471_s6] sm:$0xff] }
 0x302   :  { %1004 = vrot.lane.b32.xlu0 %v859_v5, %s1480_s28  ;;  %v1331_v37 = vld [vmem:[%s2472_s7] sm:$0xff]  ;;  %v1356_v5 = vld [vmem:[%s2473_s8 + $0x8] sm:$0xff] }
 0x304   :  { %v781_v0 = vpop.permute.xlu1 %780  ;;  %v2206_v26 = vpop.permute.xlu0 %938 }
 0x305   :  { %v2213_v29 = vsel %vm420_vm9, %v937_v36, %v2206_v26  ;;  %954 = vrot.lane.b32.xlu1 %v781_v0, %s1480_s28  ;;  %v787_v59 = vsel %vm81_vm0, %v779_v44, %v781_v0 }
 0x306   :  { %1018 = vrot.lane.b32.xlu0 %v877_v56, %s1480_s28 }
 0x308   :  { %v799_v34 = vpop.permute.xlu0 %798  ;;  %v819_v38 = vpop.permute.xlu1 %818 }
 0x309   :  { %964 = vrot.lane.b32.xlu1 %v804_v33, %s1480_s28  ;;  %v805_v60 = vsel %vm102_vm2, %v797_v25, %v799_v34  ;;  %v825_v21 = vsel %vm123_vm3, %v817_v3, %v819_v38 }
 0x30a   :  { %1032 = vrot.lane.b32.xlu0 %v897_v57, %s1480_s28 }
 0x30c   :  { %v854_v11 = vpop.permute.xlu1 %853  ;;  %v837_v22 = vpop.permute.xlu0 %836 }
 0x30d   :  { %968 = vrot.lane.b32.xlu1 %v799_v34, %s1480_s28  ;;  %v842_v62 = vsel %vm142_vm5, %v835_v48, %v837_v22  ;;  %v861_v14 = vsel %vm162_vm4, %v852_v53, %v854_v11  ;;  %v862_v6 = vsel %vm162_vm4, %v854_v11, %v2071_v1  ;;  %v1355_v1 = vld [vmem:[%s2473_s8] sm:$0xff] }
 0x30e   :  { %1046 = vrot.lane.b32.xlu0 %v915_v4, %s1480_s28 }
 0x310   :  { %v874_v63 = vpop.permute.xlu1 %873  ;;  %v912_v51 = vpop.permute.xlu0 %911 }
 0x311   :  { %978 = vrot.lane.b32.xlu1 %v824_v58, %s1480_s28  ;;  %v879_v31 = vsel %vm183_vm6, %v872_v2, %v874_v63  ;;  %v917_v44 = vsel %vm225_vm8, %v910_v42, %v912_v51  ;;  %v880_v3 = vsel %vm183_vm6, %v874_v63, %v1821_v39  ;;  %v918_v39 = vsel %vm225_vm8, %v912_v51, %v1833_v45 }
 0x312   :  { %952 = vrot.lane.b32.xlu0 %v787_v59, %s1480_s28 }
 0x314   :  { %v892_v28 = vpop.permute.xlu1 %891 }
 0x315   :  { %982 = vrot.lane.b32.xlu1 %v819_v38, %s1480_s28  ;;  %v899_v7 = vsel %vm204_vm7, %v890_v55, %v892_v28  ;;  %v900_v12 = vsel %vm204_vm7, %v892_v28, %v2079_v9  ;;  %v1332_v9 = vld [vmem:[%s2472_s7 + $0x8] sm:$0xff] }
 0x316   :  { %966 = vrot.lane.b32.xlu0 %v805_v60, %s1480_s28 }
 0x318   :  { %v2260_v40 = vpop.permute.xlu1 %940 }
 0x319   :  { %992 = vrot.lane.b32.xlu1 %v841_v16, %s1480_s28 }
 0x31a   :  { %980 = vrot.lane.b32.xlu0 %v825_v21, %s1480_s28 }
 0x31d   :  { %996 = vrot.lane.b32.xlu1 %v837_v22, %s1480_s28 }
 0x31e   :  { %994 = vrot.lane.b32.xlu0 %v842_v62, %s1480_s28 }
 0x321   :  { %1006 = vrot.lane.b32.xlu1 %v860_v10, %s1480_s28 }
 0x322   :  { %1008 = vrot.lane.b32.xlu0 %v861_v14, %s1480_s28 }
 0x325   :  { %1020 = vrot.lane.b32.xlu1 %v878_v13, %s1480_s28 }
 0x326   :  { %1022 = vrot.lane.b32.xlu0 %v879_v31, %s1480_s28 }
 0x327   :  { %v985_v18 = vpop.permute.xlu1 %984 }
 0x329   :  { %1034 = vrot.lane.b32.xlu1 %v898_v32, %s1480_s28 }
 0x32a   :  { %1036 = vrot.lane.b32.xlu0 %v899_v7, %s1480_s28 }
 0x32d   :  { %1048 = vrot.lane.b32.xlu1 %v916_v20, %s1480_s28 }
 0x32e   :  { %1050 = vrot.lane.b32.xlu0 %v917_v44, %s1480_s28 }
 0x32f   :  { %v1013_v36 = vpop.permute.xlu1 %1012  ;;  %v999_v46 = vpop.permute.xlu0 %998 }
 0x331   :  { %1010 = vrot.lane.b32.xlu1 %v862_v6, %s1480_s28  ;;  %v2337_v6 = vld [vmem:[%s2470_s3] ss:$8 sps:$4 sm:$0xff]  }
 0x332   :  { %1311 = vperm.xlu0 %1429, %v1307_v41  }
 0x335   :  { %1024 = vrot.lane.b32.xlu1 %v880_v3, %s1480_s28 }
 0x336   :  { %1335 = vperm.xlu0 %1429, %v1331_v37  }
 0x337   :  { %v1041_v47 = vpop.permute.xlu1 %1040  ;;  %v1027_v25 = vpop.permute.xlu0 %1026 }
 0x339   :  { %1038 = vrot.lane.b32.xlu1 %v900_v12, %s1480_s28 }
 0x33a   :  { %1359 = vperm.xlu0 %1429, %v1355_v1  }
 0x33b   :  { %v943_v53 = vpop.permute.xlu1 %942  ;;  %v971_v2 = vpop.permute.xlu0 %970 }
 0x33d   :  { %1052 = vrot.lane.b32.xlu1 %v918_v39, %s1480_s28 }
 0x33f   :  { %v957_v48 = vpop.permute.xlu1 %956 }
 0x341   :  { %1316 = vperm.xlu1 %1430, %v1308_v15  }
 0x344   :  { %v945_v54 = vpop.permute.xlu1 %944  ;;  %v947_v42 = vpop.permute.xlu0 %946 }
 0x345   :  { %v1060_v55 = vsel %vm420_vm9, %v943_v53, %v945_v54  ;;  %1340 = vperm.xlu1 %1430, %v1332_v9   ;;  %v1061_v45 = vsel %vm420_vm9, %v945_v54, %v947_v42 }
 0x346   :  { %1168 = vmatprep.subr.bf16.mxu1 %v1061_v45 }
 0x347   :  { %1169 = vmatpush1.bf16.msra.mxu1 %v1060_v55 }
 0x348   :  { %v2299_v0 = vpop.permute.xlu1 %960  ;;  %v959_v56 = vpop.permute.xlu0 %958 }
 0x349   :  { %v1066_v33 = vsel %vm420_vm9, %v957_v48, %v959_v56  ;;  %1364 = vperm.xlu1 %1430, %v1356_v5   ;;  %v1067_v57 = vsel %vm420_vm9, %v959_v56, %v2299_v0 }
 0x34a   :  { %1170 = vmatprep.subr.bf16.mxu1 %v1067_v57 }
 0x34b   :  { %1171 = vmatpush1.bf16.msra.mxu1 %v1066_v33 }
 0x34c   :  { %v2304_v34 = vpop.permute.xlu1 %974  ;;  %v973_v4 = vpop.permute.xlu0 %972 }
 0x34d   :  { %v1072_v58 = vsel %vm420_vm9, %v971_v2, %v973_v4  ;;  %v1073_v59 = vsel %vm420_vm9, %v973_v4, %v2304_v34 }
 0x34e   :  { %1172 = vmatprep.subr.bf16.mxu1 %v1073_v59 }
 0x34f   :  { %1173 = vmatpush1.bf16.msra.mxu1 %v1072_v58 }
 0x350   :  { %v987_v38 = vpop.permute.xlu1 %986  ;;  %v2309_v60 = vpop.permute.xlu0 %988 }
 0x351   :  { %v1078_v16 = vsel %vm420_vm9, %v985_v18, %v987_v38  ;;  %v1079_v21 = vsel %vm420_vm9, %v987_v38, %v2309_v60 }
 0x352   :  { %1174 = vmatprep.subr.bf16.mxu1 %v1079_v21 }
 0x353   :  { %1175 = vmatpush1.bf16.msra.mxu1 %v1078_v16 }
 0x354   :  { %v2314_v11 = vpop.permute.xlu1 %1002  ;;  %v1001_v22 = vpop.permute.xlu0 %1000 }
 0x355   :  { %v1084_v62 = vsel %vm420_vm9, %v999_v46, %v1001_v22  ;;  %v1085_v63 = vsel %vm420_vm9, %v1001_v22, %v2314_v11 }
 0x356   :  { %1176 = vmatprep.subr.bf16.mxu1 %v1085_v63 }
 0x357   :  { %1177 = vmatpush1.bf16.msra.mxu1 %v1084_v62 }
 0x358   :  { %v1015_v10 = vpop.permute.xlu1 %1014  ;;  %v2319_v14 = vpop.permute.xlu0 %1016 }
 0x359   :  { %v1090_v13 = vsel %vm420_vm9, %v1013_v36, %v1015_v10  ;;  %v1091_v31 = vsel %vm420_vm9, %v1015_v10, %v2319_v14  ;;  %v1059_v36 = vsel %vm420_vm9, %v2206_v26, %v2260_v40 }
 0x35a   :  { %1178 = vmatprep.subr.bf16.mxu1 %v1091_v31 }
 0x35b   :  { %1179 = vmatpush1.bf16.msra.mxu1 %v1090_v13 }
 0x35c   :  { %v2324_v28 = vpop.permute.xlu1 %1030  ;;  %v1029_v32 = vpop.permute.xlu0 %1028 }
 0x35d   :  { %v1096_v7 = vsel %vm420_vm9, %v1027_v25, %v1029_v32  ;;  %v1097_v51 = vsel %vm420_vm9, %v1029_v32, %v2324_v28 }
 0x35e   :  { %1180 = vmatprep.subr.bf16.mxu1 %v1097_v51 }
 0x35f   :  { %1181 = vmatpush1.bf16.msra.mxu1 %v1096_v7 }
 0x360   :  { %v1043_v20 = vpop.permute.xlu1 %1042  ;;  %v2329_v44 = vpop.permute.xlu0 %1044 }
 0x361   :  { %v1102_v18 = vsel %vm420_vm9, %v1041_v47, %v1043_v20  ;;  %v1103_v41 = vsel %vm420_vm9, %v1043_v20, %v2329_v44 }
 0x362   :  { %1182 = vmatprep.subr.bf16.mxu1 %v1103_v41 }
 0x363   :  { %1183 = vmatpush1.bf16.msra.mxu1 %v1102_v18 }
 0x364   :  { %v951_v37 = vpop.permute.xlu1 %950  ;;  %1252 = vmatprep.subr.bf16.mxu1 %v1059_v36  ;;  %v949_v3 = vpop.permute.xlu0 %948 }
 0x365   :  { %v1062_v46 = vsel %vm420_vm9, %v947_v42, %v949_v3  ;;  %v1063_v47 = vsel %vm420_vm9, %v949_v3, %v951_v37 }
 0x366   :  { %1199 = vmatmul.mubr.bf16.vlgmr.msra.gmra.mrb[4].mxu1 %v2337_v6  ;;  %1211 = vmatprep.subr.bf16.mxu0 %v1063_v47 }
 0x367   :  { %1212 = vmatpush1.bf16.msra.mxu0 %v1062_v46  ;;  %1253 = vmatpush1.bf16.msra.mxu1 %v2213_v29 }
 0x368   :  { %v963_v1 = vpop.permute.xlu0 %962  ;;  %1418 = vmatprep.mubr.msk.bf16.mxu1 %vm1162_vm11, %v2148_v52 }
 0x369   :  { %v1068_v2 = vsel %vm420_vm9, %v2299_v0, %v963_v1 }
 0x36c   :  { %v977_v12 = vpop.permute.xlu0 %976 }
 0x36d   :  { %v1074_v55 = vsel %vm420_vm9, %v2304_v34, %v977_v12 }
 0x370   :  { %v991_v25 = vpop.permute.xlu0 %990 }
 0x371   :  { %v1080_v59 = vsel %vm420_vm9, %v2309_v60, %v991_v25 }
 0x374   :  { %v1005_v26 = vpop.permute.xlu0 %1004 }
 0x375   :  { %v1086_v60 = vsel %vm420_vm9, %v2314_v11, %v1005_v26 }
 0x377   :  { %v955_v40 = vpop.permute.xlu1 %954 }
 0x378   :  { %v1019_v53 = vpop.permute.xlu0 %1018 }
 0x379   :  { %v1092_v7 = vsel %vm420_vm9, %v2319_v14, %v1019_v53 }
 0x37b   :  { %v965_v39 = vpop.permute.xlu1 %964 }
 0x37c   :  { %v1033_v15 = vpop.permute.xlu0 %1032  ;;  %v1069_v48 = vsel %vm420_vm9, %v963_v1, %v965_v39 }
 0x37d   :  { %1213 = vmatprep.subr.bf16.mxu0 %v1069_v48  ;;  %v1098_v41 = vsel %vm420_vm9, %v2324_v28, %v1033_v15 }
 0x37e   :  { %1214 = vmatpush1.bf16.msra.mxu0 %v1068_v2 }
 0x37f   :  { %v969_v9 = vpop.permute.xlu1 %968 }
 0x380   :  { %v1047_v29 = vpop.permute.xlu0 %1046 }
 0x383   :  { %v979_v54 = vpop.permute.xlu1 %978 }
 0x384   :  { %v953_v42 = vpop.permute.xlu0 %952  ;;  %v1075_v52 = vsel %vm420_vm9, %v977_v12, %v979_v54 }
 0x385   :  { %v1064_v45 = vsel %vm420_vm9, %v951_v37, %v953_v42  ;;  %1215 = vmatprep.subr.bf16.mxu0 %v1075_v52  ;;  %v1065_v5 = vsel %vm420_vm9, %v953_v42, %v955_v40  ;;  %v1104_v37 = vsel %vm420_vm9, %v2329_v44, %v1047_v29 }
 0x386   :  { %1216 = vmatpush1.bf16.msra.mxu0 %v1074_v55  ;;  %1254 = vmatprep.subr.bf16.mxu1 %v1065_v5 }
 0x387   :  { %v983_v56 = vpop.permute.xlu1 %982  ;;  %1255 = vmatpush1.bf16.msra.mxu1 %v1064_v45 }
 0x388   :  { %v967_v0 = vpop.permute.xlu0 %966 }
 0x389   :  { %v1070_v33 = vsel %vm420_vm9, %v965_v39, %v967_v0  ;;  %v1071_v57 = vsel %vm420_vm9, %v967_v0, %v969_v9 }
 0x38a   :  { %1256 = vmatprep.subr.bf16.mxu1 %v1071_v57 }
 0x38b   :  { %v993_v4 = vpop.permute.xlu1 %992  ;;  %1257 = vmatpush1.bf16.msra.mxu1 %v1070_v33 }
 0x38c   :  { %v981_v58 = vpop.permute.xlu0 %980  ;;  %v1081_v34 = vsel %vm420_vm9, %v991_v25, %v993_v4 }
 0x38d   :  { %v1076_v38 = vsel %vm420_vm9, %v979_v54, %v981_v58  ;;  %1217 = vmatprep.subr.bf16.mxu0 %v1081_v34  ;;  %v1077_v16 = vsel %vm420_vm9, %v981_v58, %v983_v56 }
 0x38e   :  { %1218 = vmatpush1.bf16.msra.mxu0 %v1080_v59  ;;  %1258 = vmatprep.subr.bf16.mxu1 %v1077_v16 }
 0x38f   :  { %v997_v21 = vpop.permute.xlu1 %996  ;;  %1259 = vmatpush1.bf16.msra.mxu1 %v1076_v38 }
 0x390   :  { %v995_v22 = vpop.permute.xlu0 %994 }
 0x391   :  { %v1082_v62 = vsel %vm420_vm9, %v993_v4, %v995_v22  ;;  %v1083_v63 = vsel %vm420_vm9, %v995_v22, %v997_v21 }
 0x392   :  { %1260 = vmatprep.subr.bf16.mxu1 %v1083_v63 }
 0x393   :  { %v1007_v10 = vpop.permute.xlu1 %1006  ;;  %1261 = vmatpush1.bf16.msra.mxu1 %v1082_v62 }
 0x394   :  { %v1087_v13 = vsel %vm420_vm9, %v1005_v26, %v1007_v10  ;;  %v1009_v20 = vpop.permute.xlu0 %1008 }
 0x395   :  { %1219 = vmatprep.subr.bf16.mxu0 %v1087_v13  ;;  %v1088_v47 = vsel %vm420_vm9, %v1007_v10, %v1009_v20 }
 0x396   :  { %1220 = vmatpush1.bf16.msra.mxu0 %v1086_v60 }
 0x397   :  { %v1021_v31 = vpop.permute.xlu1 %1020 }
 0x398   :  { %v1093_v32 = vsel %vm420_vm9, %v1019_v53, %v1021_v31  ;;  %v1023_v3 = vpop.permute.xlu0 %1022 }
 0x399   :  { %1221 = vmatprep.subr.bf16.mxu0 %v1093_v32  ;;  %v1094_v25 = vsel %vm420_vm9, %v1021_v31, %v1023_v3 }
 0x39a   :  { %1222 = vmatpush1.bf16.msra.mxu0 %v1092_v7 }
 0x39b   :  { %v1035_v51 = vpop.permute.xlu1 %1034 }
 0x39c   :  { %v1099_v18 = vsel %vm420_vm9, %v1033_v15, %v1035_v51  ;;  %v1037_v1 = vpop.permute.xlu0 %1036 }
 0x39d   :  { %1223 = vmatprep.subr.bf16.mxu0 %v1099_v18  ;;  %v1100_v40 = vsel %vm420_vm9, %v1035_v51, %v1037_v1 }
 0x39e   :  { %1224 = vmatpush1.bf16.msra.mxu0 %v1098_v41 }
 0x39f   :  { %v1049_v11 = vpop.permute.xlu1 %1048 }
 0x3a0   :  { %v1105_v36 = vsel %vm420_vm9, %v1047_v29, %v1049_v11  ;;  %v1051_v53 = vpop.permute.xlu0 %1050 }
 0x3a1   :  { %1225 = vmatprep.subr.bf16.mxu0 %v1105_v36  ;;  %v1106_v48 = vsel %vm420_vm9, %v1049_v11, %v1051_v53 }
 0x3a2   :  { %1226 = vmatpush1.bf16.msra.mxu0 %v1104_v37 }
 0x3a3   :  { %v1011_v14 = vpop.permute.xlu1 %1010 }
 0x3a4   :  { %v1089_v46 = vsel %vm420_vm9, %v1009_v20, %v1011_v14 }
 0x3a5   :  { %1242 = vmatmul.mubr.bf16.vlgmr.msra.gmra.mrb[8].mxu0 %v2337_v6  ;;  %1262 = vmatprep.subr.bf16.mxu1 %v1089_v46 }
 0x3a6   :  { %1263 = vmatpush1.bf16.msra.mxu1 %v1088_v47 }
 0x3a7   :  { %v1025_v28 = vpop.permute.xlu1 %1024 }
 0x3a8   :  { %v1095_v12 = vsel %vm420_vm9, %v1023_v3, %v1025_v28 }
 0x3a9   :  { %1264 = vmatprep.subr.bf16.mxu1 %v1095_v12 }
 0x3aa   :  { %1265 = vmatpush1.bf16.msra.mxu1 %v1094_v25 }
 0x3ab   :  { %v1039_v44 = vpop.permute.xlu1 %1038 }
 0x3ac   :  { %v1101_v26 = vsel %vm420_vm9, %v1037_v1, %v1039_v44 }
 0x3ad   :  { %1266 = vmatprep.subr.bf16.mxu1 %v1101_v26 }
 0x3ae   :  { %1267 = vmatpush1.bf16.msra.mxu1 %v1100_v40 }
 0x3af   :  { %v1053_v39 = vpop.permute.xlu1 %1052 }
 0x3b0   :  { %v1107_v15 = vsel %vm420_vm9, %v1051_v53, %v1053_v39 }
 0x3b1   :  { %1268 = vmatprep.subr.bf16.mxu1 %v1107_v15  ;;  %v2387_v2 = vpop.permute.xlu0 %1311 }
 0x3b2   :  { %1269 = vmatpush1.bf16.msra.mxu1 %v1106_v48 }
 0x3b5   :  { %1285 = vmatmul.mubr.bf16.vlgmr.msra.gmra.mrb[8].mxu1 %v2337_v6  ;;  %v2391_v29 = vpop.permute.xlu0 %1335 }
 0x3b9   :  { %v2396_v57 = vpop.permute.xlu0 %1359 }
 0x3ba   :  { %v1367_v21 = vmul.f32 %v2396_v57, %v1935_v35  ;;  %v1368_v63 = vmul.f32 %v2396_v57, %v1979_v23  ;;  %v1370_v28 = vmul.f32 %v2396_v57, %v2001_v27  ;;  %v1369_v12 = vmul.f32 %v2396_v57, %v1947_v30 }
 0x3c0   :  { %v2389_v9 = vpop.permute.xlu1 %1316 }
 0x3c4   :  { %v2393_v54 = vpop.permute.xlu1 %1340 }
 0x3c8   :  { %v2398_v6 = vpop.permute.xlu1 %1364 }
 0x3c9   :  { %v1373_v62 = vmul.f32 %v2398_v6, %v1941_v8  ;;  %v1374_v13 = vmul.f32 %v2398_v6, %v1976_v17  ;;  %v1375_v44 = vmul.f32 %v2398_v6, %v1952_v43  ;;  %v1376_v53 = vmul.f32 %v2398_v6, %v1998_v24 }
 0x439   :  { %v1200_v42 = vpop.f32.mrb[4].mxu1 }
 0x43a   :  { %v1295_v52 = vmax.f32 %v1200_v42, 0.0  ;;  %v1202_v55 = vpop.f32.mrb[5].mxu1 }
 0x43b   :  { %v1296_v45 = vmax.f32 %v1202_v55, 0.0  ;;  %v1204_v5 = vpop.f32.mrb[6].mxu1 }
 0x43c   :  { %v1319_v56 = vmul.f32 %v2387_v2, %v1295_v52  ;;  %v1301_v0 = vmax.f32 %v1204_v5, 0.0  ;;  %v1206_v33 = vpop.f32.mrb[7].mxu1 }
 0x43d   :  { %v1320_v4 = vmul.f32 %v2387_v2, %v1296_v45  ;;  %v1302_v58 = vmax.f32 %v1206_v33, 0.0 }
 0x43e   :  { %v1343_v34 = vadd.f32 %v2391_v29, %v1319_v56  ;;  %v1325_v59 = vmul.f32 %v2389_v9, %v1301_v0 }
 0x43f   :  { %v1344_v38 = vadd.f32 %v2391_v29, %v1320_v4  ;;  %v1326_v16 = vmul.f32 %v2389_v9, %v1302_v58  ;;  %v1371_v58 = vmul.f32 %v2396_v57, %v2023_v50  ;;  %v1378_v50 = vmul.f32 %v2398_v6, %v2046_v19 }
 0x440   :  { %v1349_v22 = vadd.f32 %v2393_v54, %v1325_v59  ;;  %v1379_v60 = vadd.f32 %v1367_v21, %v1343_v34 }
 0x441   :  { %v1350_v10 = vadd.f32 %v2393_v54, %v1326_v16  ;;  %v1380_v32 = vadd.f32 %v1368_v63, %v1344_v38  ;;  %v1372_v38 = vmul.f32 %v2396_v57, %v2049_v61 }
 0x442   :  { %v1385_v31 = vadd.f32 %v1373_v62, %v1349_v22 }
 0x443   :  { %v1386_v7 = vadd.f32 %v1374_v13, %v1350_v10 }
 0x444   :  { %v1391_v51 = vadd.f32 %v1385_v31, %v1379_v60 }
 0x445   :  { %v1392_v20 = vadd.f32 %v1386_v7, %v1380_v32 }
 0x446   :  { %1397 = vst [vmem:[%s2474_s9] sm:$0xff] %v1391_v51 }
 0x447   :  { %1398 = vst [vmem:[%s2474_s9 + $0x8] sm:$0xff] %v1392_v20 }
 0x478   :  { %v1243_v35 = vpop.f32.mrb[8].mxu0 }
 0x479   :  { %v1297_v8 = vmax.f32 %v1243_v35, 0.0  ;;  %v1245_v23 = vpop.f32.mrb[9].mxu0 }
 0x47a   :  { %v1298_v18 = vmax.f32 %v1245_v23, 0.0  ;;  %v1247_v41 = vpop.f32.mrb[10].mxu0 }
 0x47b   :  { %v1321_v17 = vmul.f32 %v2387_v2, %v1297_v8  ;;  %v1303_v11 = vmax.f32 %v1247_v41, 0.0  ;;  %v1249_v36 = vpop.f32.mrb[11].mxu0 }
 0x47c   :  { %v1322_v37 = vmul.f32 %v2387_v2, %v1298_v18  ;;  %v1304_v3 = vmax.f32 %v1249_v36, 0.0 }
 0x47d   :  { %v1345_v14 = vadd.f32 %v2391_v29, %v1321_v17  ;;  %v1327_v46 = vmul.f32 %v2389_v9, %v1303_v11 }
 0x47e   :  { %v1346_v47 = vadd.f32 %v2391_v29, %v1322_v37  ;;  %v1328_v1 = vmul.f32 %v2389_v9, %v1304_v3 }
 0x47f   :  { %v1351_v25 = vadd.f32 %v2393_v54, %v1327_v46  ;;  %v1381_v39 = vadd.f32 %v1369_v12, %v1345_v14 }
 0x480   :  { %v1382_v26 = vadd.f32 %v1370_v28, %v1346_v47  ;;  %v1352_v40 = vadd.f32 %v2393_v54, %v1328_v1 }
 0x481   :  { %v1387_v15 = vadd.f32 %v1375_v44, %v1351_v25 }
 0x482   :  { %v1388_v48 = vadd.f32 %v1376_v53, %v1352_v40 }
 0x483   :  { %v1393_v27 = vadd.f32 %v1387_v15, %v1381_v39 }
 0x484   :  { %v1394_v42 = vadd.f32 %v1388_v48, %v1382_v26 }
 0x485   :  { %1399 = vst [vmem:[%s2474_s9 + $0x10] sm:$0xff] %v1393_v27 }
 0x486   :  { %1400 = vst [vmem:[%s2474_s9 + $0x18] sm:$0xff] %v1394_v42 }
 0x488   :  { %v1286_v30 = vpop.f32.mrb[8].mxu1 }
 0x489   :  { %v1299_v43 = vmax.f32 %v1286_v30, 0.0  ;;  %v1288_v52 = vpop.f32.mrb[9].mxu1 }
 0x48a   :  { %v1300_v55 = vmax.f32 %v1288_v52, 0.0  ;;  %v1290_v45 = vpop.f32.mrb[10].mxu1 }
 0x48b   :  { %v1323_v24 = vmul.f32 %v2387_v2, %v1299_v43  ;;  %v1305_v5 = vmax.f32 %v1290_v45, 0.0  ;;  %v1292_v56 = vpop.f32.mrb[11].mxu1 }
 0x48c   :  { %v1324_v0 = vmul.f32 %v2387_v2, %v1300_v55  ;;  %v1306_v33 = vmax.f32 %v1292_v56, 0.0  ;;  %v1377_v2 = vmul.f32 %v2398_v6, %v2020_v49 }
 0x48d   :  { %v1347_v4 = vadd.f32 %v2391_v29, %v1323_v24  ;;  %v1329_v34 = vmul.f32 %v2389_v9, %v1305_v5 }
 0x48e   :  { %v1348_v59 = vadd.f32 %v2391_v29, %v1324_v0  ;;  %v1330_v16 = vmul.f32 %v2389_v9, %v1306_v33 }
 0x48f   :  { %v1383_v21 = vadd.f32 %v1371_v58, %v1347_v4  ;;  %v1353_v22 = vadd.f32 %v2393_v54, %v1329_v34 }
 0x490   :  { %v1384_v62 = vadd.f32 %v1372_v38, %v1348_v59  ;;  %v1354_v63 = vadd.f32 %v2393_v54, %v1330_v16 }
 0x491   :  { %v1389_v10 = vadd.f32 %v1377_v2, %v1353_v22 }
 0x492   :  { %v1390_v13 = vadd.f32 %v1378_v50, %v1354_v63 }
 0x493   :  { %v1395_v29 = vadd.f32 %v1389_v10, %v1383_v21 }
 0x494   :  { %v1396_v60 = vadd.f32 %v1390_v13, %v1384_v62 }
 0x495   :  { %1401 = vst [vmem:[%s2474_s9 + $0x20] sm:$0xff] %v1395_v29 }
 0x496   :  { %1402 = vst [vmem:[%s2474_s9 + $0x28] sm:$0xff] %v1396_v60 }

</bundles_post_ra>
